<compile_context>
chip_gen: v7x
topology: tpu7x:2x2x1
jax: 0.10.0
libtpu: 0.0.40
codegen_flags: <defaults>
</compile_context>

<pallas_src>
import functools
import math

import jax
import jax.numpy as jnp
from jax.experimental import pallas as pl
from jax.experimental.pallas import tpu as pltpu

EPS = 1e-5


def _round_up(x, m):
    return ((x + m - 1) // m) * m


def _layernorm(x, gamma, beta, n_true):
    # Padding-exact LayerNorm: channels >= n_true are zero-padded, so the sums
    # are exact; the biased variance is computed as E[x^2] - mu^2 so zero padding
    # does not perturb it.  gamma/beta are zero in padded lanes -> output 0 there.
    inv_n = 1.0 / float(n_true)
    mu = jnp.sum(x, axis=-1, keepdims=True) * inv_n
    ex2 = jnp.sum(x * x, axis=-1, keepdims=True) * inv_n
    var = ex2 - mu * mu
    return (x - mu) * jax.lax.rsqrt(var + EPS) * gamma + beta


def cross_attention_kernel(
    xq_ref, xkv_ref,
    qg_ref, qb_ref, kvg_ref, kvb_ref,
    wq_t_ref, bq_ref, wkv_t_ref, bkv_ref,
    wo_h_ref, bo_ref,
    o_ref,
    *, num_heads, head_dim, q_channels, kv_channels, compute_dtype,
):
    Bt, Lq, EqP = xq_ref.shape
    _, Lkv, EkvP = xkv_ref.shape
    H = num_heads
    hdP = wo_h_ref.shape[1]          # lane-padded per-head dim (multiple of 128)
    EP = H * hdP
    cdt = compute_dtype

    # --- pre-norms in f32 (v5e VPU/EUP have no bf16).  Bt batch rows are
    # flattened so the projections present a tall M dim to the MXU. ---
    xq = xq_ref[...].reshape(Bt * Lq, EqP).astype(jnp.float32)
    xkv = xkv_ref[...].reshape(Bt * Lkv, EkvP).astype(jnp.float32)
    q_in = _layernorm(xq, qg_ref[...], qb_ref[...], q_channels)
    kv_in = _layernorm(xkv, kvg_ref[...], kvb_ref[...], kv_channels)

    # --- input projections: pre-transposed, per-head lane-padded weights; K/V
    # fused into one matmul.  Only MXU inputs are cast to compute_dtype; the
    # accumulation and bias adds stay f32 (bf16 path double-rounds Q/K/V by design).
    qp = jnp.dot(q_in.astype(cdt), wq_t_ref[...],
                 preferred_element_type=jnp.float32) + bq_ref[...]       # (Bt*Lq, EP)
    kvp = jnp.dot(kv_in.astype(cdt), wkv_t_ref[...],
                  preferred_element_type=jnp.float32) + bkv_ref[...]     # (Bt*Lkv, 2EP)
    qp = qp.reshape(Bt, Lq, EP)
    kvp = kvp.reshape(Bt, Lkv, 2 * EP)

    scale = 1.0 / math.sqrt(head_dim)

    # TODO(synk): key_padding_mask / attn_mask are not wired in (callers pass None).
    # TODO(synk): for long Lkv add an "arbitrary" Lkv grid axis with online softmax
    # (flash-style) so K/V and the (H, Lq, Lkv) scores need not be fully
    # VMEM-resident; required before targeting long sequences on v7x (64 MiB VMEM).
    for b in range(Bt):                                  # static unroll; Bt is small
        qpb = qp[b]                                      # (Lq, EP)
        kvpb = kvp[b]                                    # (Lkv, 2EP)

        # Head split along 128-aligned lane groups (hdP % 128 == 0) -> cheap
        # aligned slices stacked into a leading "head" batch dim, so attention
        # runs as batched dot_generals instead of H tiny serialized matmuls.
        qh = jnp.stack([qpb[:, h * hdP:(h + 1) * hdP] for h in range(H)]).astype(cdt)
        kh = jnp.stack([kvpb[:, h * hdP:(h + 1) * hdP] for h in range(H)]).astype(cdt)
        vh = jnp.stack([kvpb[:, EP + h * hdP:EP + (h + 1) * hdP]
                        for h in range(H)]).astype(cdt)                   # (H, Lkv, hdP)

        s = jnp.einsum("hqd,hkd->hqk", qh, kh,
                       preferred_element_type=jnp.float32) * scale        # (H, Lq, Lkv)
        s = s - jnp.max(s, axis=-1, keepdims=True)
        p = jnp.exp(s)
        # approx reciprocal runs on the EUP slot (~free); use an exact divide if
        # strict parity with torch softmax is required.
        p = p * pl.reciprocal(jnp.sum(p, axis=-1, keepdims=True), approx=True)

        ctx = jnp.einsum("hqk,hkd->hqd", p.astype(cdt), vh,
                         preferred_element_type=jnp.float32)              # (H, Lq, hdP)

        # Per-head output projection summed over heads: no lane-dim head re-merge,
        # no masked partial stores, no (Lq, E) scratch round-trip.
        proj = jnp.einsum("hqd,hdn->hqn", ctx.astype(cdt), wo_h_ref[...],
                          preferred_element_type=jnp.float32)             # (H, Lq, n_out)
        out_b = jnp.sum(proj, axis=0) + bo_ref[...]                       # (Lq, n_out)
        o_ref[b] = out_b.astype(o_ref.dtype)


def _pad_last(a, target):
    pad = target - a.shape[-1]
    if pad:
        a = jnp.pad(a, [(0, 0)] * (a.ndim - 1) + [(0, pad)])
    return a


def _pick_batch_tile(B, Lq):
    # Fill the MXU M dim (~256 rows) when Lq is small, but keep >=2 grid steps
    # when B >= 2 so both v7x TensorCores receive work.
    target = max(1, 256 // max(Lq, 1))
    divs = [d for d in range(1, B + 1) if B % d == 0 and d <= min(target, 16)]
    pref = [d for d in divs if B // d >= 2]
    return max(pref) if pref else max(divs)


def _vmem_capacity_bytes(default=64 * 1024 * 1024):
    # v7x: 64 MiB/TC, v5e/v6e: 128 MiB.  Query when available, else be conservative.
    try:
        info = pltpu.get_tpu_info()
        for name in ("vmem_capacity_bytes", "vmem_capacity", "vmem_bytes"):
            v = getattr(info, name, None)
            if v:
                return int(v)
    except Exception:
        pass
    return default


def cross_attention(x_q, x_kv, params, num_heads, *, compute_dtype=jnp.bfloat16):
    """Forward of CrossAttention: LN(q), LN(kv), MultiheadAttention(q, kv, kv)."""
    B, Lq, Eq = x_q.shape
    _, Lkv, Ekv = x_kv.shape
    E = params["wq"].shape[0]                 # embed dim (== Eq)
    if E != Eq:
        raise ValueError("wq out_features must equal num_q_channels")
    if E % num_heads:
        raise ValueError("embed_dim must be divisible by num_heads")
    hd = E // num_heads

    # --- lane padding: channel dims rounded up to multiples of 128 so every
    # in-kernel operand/slice/store is lane-aligned.  All padded weight/bias
    # entries are zero and LayerNorm is padding-exact, so the math is unchanged.
    EqP = _round_up(Eq, 128)
    EkvP = _round_up(Ekv, 128)
    hdP = _round_up(hd, 128)
    EP = num_heads * hdP
    n_out = EqP                               # lane-dense output cols; sliced after call
    f32 = jnp.float32

    def head_pad_in(w, in_pad):               # torch (E, In) -> (in_pad, H*hdP)
        w_t = jnp.asarray(w, f32).T                                    # (In, E)
        w_t = w_t.reshape(w_t.shape[0], num_heads, hd)
        w_t = jnp.pad(w_t, ((0, in_pad - w_t.shape[0]), (0, 0), (0, hdP - hd)))
        return w_t.reshape(in_pad, EP)

    def head_pad_bias(b):                     # (1, E) -> (1, H*hdP)
        b = jnp.asarray(b, f32).reshape(1, num_heads, hd)
        b = jnp.pad(b, ((0, 0), (0, 0), (0, hdP - hd)))
        return b.reshape(1, EP)

    wq_t = head_pad_in(params["wq"], EqP).astype(compute_dtype)          # (EqP, EP)
    wkv_t = jnp.concatenate(
        [head_pad_in(params["wk"], EkvP), head_pad_in(params["wv"], EkvP)],
        axis=1).astype(compute_dtype)                                     # (EkvP, 2EP)
    bq = head_pad_bias(params["bq"])                                      # (1, EP) f32
    bkv = jnp.concatenate([head_pad_bias(params["bk"]),
                           head_pad_bias(params["bv"])], axis=1)          # (1, 2EP) f32

    # output projection, per-head: torch (Eq, E) -> (H, hdP, n_out)
    wo_h = jnp.asarray(params["wo"], f32).T.reshape(num_heads, hd, Eq)
    wo_h = jnp.pad(wo_h, ((0, 0), (0, hdP - hd), (0, n_out - Eq))).astype(compute_dtype)
    bo = _pad_last(jnp.asarray(params["bo"], f32), n_out)                 # (1, n_out)

    qg = _pad_last(jnp.asarray(params["q_gamma"], f32), EqP)
    qb = _pad_last(jnp.asarray(params["q_beta"], f32), EqP)
    kvg = _pad_last(jnp.asarray(params["kv_gamma"], f32), EkvP)
    kvb = _pad_last(jnp.asarray(params["kv_beta"], f32), EkvP)

    x_q_p = _pad_last(x_q, EqP)
    x_kv_p = _pad_last(x_kv, EkvP)

    Bt = _pick_batch_tile(B, Lq)
    grid = (B // Bt,)

    def const2d(shape):
        return pl.BlockSpec(shape, lambda g: (0, 0))

    def const3d(shape):
        return pl.BlockSpec(shape, lambda g: (0, 0, 0))

    in_specs = [
        pl.BlockSpec((Bt, Lq, EqP), lambda g: (g, 0, 0)),      # x_q block
        pl.BlockSpec((Bt, Lkv, EkvP), lambda g: (g, 0, 0)),    # x_kv block
        const2d((1, EqP)), const2d((1, EqP)),                  # q_norm gamma / beta
        const2d((1, EkvP)), const2d((1, EkvP)),                # kv_norm gamma / beta
        # TODO(synk): mark these constant-index weight blocks pipeline_mode=pl.Buffered(1)
        # (single-buffered) once verified on the target jax version -> halves their
        # VMEM footprint on v7x (64 MiB) for large E.
        const2d((EqP, EP)),                                    # Wq^T (per-head padded)
        const2d((1, EP)),                                      # bq
        const2d((EkvP, 2 * EP)),                               # [Wk^T | Wv^T]
        const2d((1, 2 * EP)),                                  # [bk | bv]
        const3d((num_heads, hdP, n_out)),                      # Wo per head
        const2d((1, n_out)),                                   # bo
    ]
    out_spec = pl.BlockSpec((Bt, Lq, n_out), lambda g: (g, 0, 0))

    args = (x_q_p, x_kv_p, qg, qb, kvg, kvb, wq_t, bq, wkv_t, bkv, wo_h, bo)

    # Cost estimate with dtype-accurate byte counts (incl. biases/gammas).
    out_itemsize = jnp.dtype(x_q.dtype).itemsize
    bytes_accessed = int(sum(int(a.size) * a.dtype.itemsize for a in args)
                         + B * Lq * n_out * out_itemsize)
    flops = int(2 * B * (Lq * EqP * EP + Lkv * EkvP * 2 * EP
                         + num_heads * 2 * Lq * Lkv * hdP
                         + num_heads * Lq * hdP * n_out))
    cost = pl.CostEstimate(flops=flops,
                           transcendentals=int(B * num_heads * Lq * Lkv),
                           bytes_accessed=bytes_accessed)

    # VMEM budget derived from actual block sizes: double-buffered pipelined
    # activations/output, (double-buffered) constant weight blocks, and the f32
    # intermediates; clamped below the per-chip capacity with headroom for v7x.
    in_b = jnp.dtype(x_q.dtype).itemsize
    blk_io = (Bt * Lq * EqP + Bt * Lkv * EkvP) * in_b + Bt * Lq * n_out * out_itemsize
    const_b = int(sum(int(a.size) * a.dtype.itemsize for a in args[2:]))
    live_f32 = 4 * (2 * Bt * (Lq * EqP + Lkv * EkvP)
                    + Bt * Lq * EP + Bt * Lkv * 2 * EP
                    + num_heads * (2 * Lq * Lkv + 3 * Lq * hdP + Lq * n_out)
                    + Lq * n_out)
    need = 2 * blk_io + 2 * const_b + live_f32
    cap = _vmem_capacity_bytes()
    vmem_limit = int(min(max(2 * need, 16 * 1024 * 1024), int(0.9 * cap)))

    out = pl.pallas_call(
        functools.partial(cross_attention_kernel, num_heads=num_heads,
                          head_dim=hd, q_channels=Eq, kv_channels=Ekv,
                          compute_dtype=compute_dtype),
        out_shape=jax.ShapeDtypeStruct((B, Lq, n_out), x_q.dtype),
        grid_spec=pltpu.PrefetchScalarGridSpec(
            num_scalar_prefetch=0,
            grid=grid,
            in_specs=in_specs,
            out_specs=out_spec,
        ),
        compiler_params=pltpu.CompilerParams(
            dimension_semantics=("parallel",),   # >=2 steps when B>=2 -> both v7x TCs
            vmem_limit_bytes=vmem_limit,
        ),
        cost_estimate=cost,
    )(*args)
    return out[..., :Eq]


def cross_attention_ref(x_q, x_kv, params, num_heads):
    """Pure-JAX reference mirroring PyTorch CrossAttention semantics."""
    def ln(x, g, b):
        mu = jnp.mean(x, axis=-1, keepdims=True)
        var = jnp.mean((x - mu) ** 2, axis=-1, keepdims=True)
        return (x - mu) * jax.lax.rsqrt(var + EPS) * g + b

    q = ln(x_q, params["q_gamma"], params["q_beta"])
    kv = ln(x_kv, params["kv_gamma"], params["kv_beta"])

    qp = q @ params["wq"].T + params["bq"]
    kp = kv @ params["wk"].T + params["bk"]
    vp = kv @ params["wv"].T + params["bv"]

    B, Lq, E = qp.shape
    Lkv = kp.shape[1]
    hd = E // num_heads
    qh = qp.reshape(B, Lq, num_heads, hd).transpose(0, 2, 1, 3)
    kh = kp.reshape(B, Lkv, num_heads, hd).transpose(0, 2, 1, 3)
    vh = vp.reshape(B, Lkv, num_heads, hd).transpose(0, 2, 1, 3)

    s = jnp.einsum("bhqd,bhkd->bhqk", qh, kh) / math.sqrt(hd)
    p = jax.nn.softmax(s, axis=-1)
    ctx = jnp.einsum("bhqk,bhkd->bhqd", p, vh)
    ctx = ctx.transpose(0, 2, 1, 3).reshape(B, Lq, E)
    return ctx @ params["wo"].T + params["bo"]


def make_params(key, num_q_channels, num_kv_channels):
    ks = jax.random.split(key, 10)
    f32 = jnp.float32
    return {
        "q_gamma": (1.0 + 0.05 * jax.random.normal(ks[0], (1, num_q_channels), f32)),
        "q_beta": 0.05 * jax.random.normal(ks[1], (1, num_q_channels), f32),
        "kv_gamma": (1.0 + 0.05 * jax.random.normal(ks[2], (1, num_kv_channels), f32)),
        "kv_beta": 0.05 * jax.random.normal(ks[3], (1, num_kv_channels), f32),
        # MultiheadAttention projections (PyTorch convention: (out, in))
        "wq": 0.1 * jax.random.normal(ks[4], (num_q_channels, num_q_channels), f32),
        "bq": 0.01 * jax.random.normal(ks[5], (1, num_q_channels), f32),
        "wk": 0.1 * jax.random.normal(ks[6], (num_q_channels, num_kv_channels), f32),
        "bk": 0.01 * jax.random.normal(ks[7], (1, num_q_channels), f32),
        "wv": 0.1 * jax.random.normal(ks[8], (num_q_channels, num_kv_channels), f32),
        "bv": 0.01 * jax.random.normal(ks[9], (1, num_q_channels), f32),
        "wo": 0.1 * jax.random.normal(jax.random.fold_in(key, 100),
                                      (num_q_channels, num_q_channels), f32),
        "bo": 0.01 * jax.random.normal(jax.random.fold_in(key, 101),
                                       (1, num_q_channels), f32),
    }


if __name__ == "__main__":
    B, Lq, Lkv = 2, 8, 16
    num_q_channels, num_kv_channels, num_heads = 32, 24, 4

    key = jax.random.PRNGKey(0)
    kq, kkv, kp = jax.random.split(key, 3)
    x_q = jax.random.normal(kq, (B, Lq, num_q_channels), jnp.float32)
    x_kv = jax.random.normal(kkv, (B, Lkv, num_kv_channels), jnp.float32)
    params = make_params(kp, num_q_channels, num_kv_channels)

    ref = cross_attention_ref(x_q, x_kv, params, num_heads)

    # Default path: bf16 MXU inputs on all generations (v5e's MXU runs bf16 at
    # full rate; only its VPU/EUP lack bf16, and all elementwise math stays f32).
    out = jax.block_until_ready(cross_attention(x_q, x_kv, params, num_heads))
    assert out.shape == (B, Lq, num_q_channels)
    assert jnp.allclose(out, ref, atol=5e-2, rtol=5e-2), \
        f"bf16 max abs err = {jnp.max(jnp.abs(out - ref))}"

    # Strict f32 MXU-input path.
    out_f32 = jax.block_until_ready(
        cross_attention(x_q, x_kv, params, num_heads, compute_dtype=jnp.float32))
    assert out_f32.shape == (B, Lq, num_q_channels)
    assert jnp.allclose(out_f32, ref, atol=5e-3, rtol=5e-3), \
        f"f32 max abs err = {jnp.max(jnp.abs(out_f32 - ref))}"

    print("KERNEL_OK")
</pallas_src>

<mosaic_0001>
module attributes {stable_mosaic.version = 11 : i64} {
  func.func @cross_attention_kernel(%arg0: i32, %arg1: memref<1x8x128xf32, #tpu.memory_space<vmem>>, %arg2: memref<1x16x128xf32, #tpu.memory_space<vmem>>, %arg3: memref<1x128xf32, #tpu.memory_space<vmem>>, %arg4: memref<1x128xf32, #tpu.memory_space<vmem>>, %arg5: memref<1x128xf32, #tpu.memory_space<vmem>>, %arg6: memref<1x128xf32, #tpu.memory_space<vmem>>, %arg7: memref<128x512xbf16, #tpu.memory_space<vmem>>, %arg8: memref<1x512xf32, #tpu.memory_space<vmem>>, %arg9: memref<128x1024xbf16, #tpu.memory_space<vmem>>, %arg10: memref<1x1024xf32, #tpu.memory_space<vmem>>, %arg11: memref<4x128x128xbf16, #tpu.memory_space<vmem>>, %arg12: memref<1x128xf32, #tpu.memory_space<vmem>>, %arg13: memref<1x8x128xf32, #tpu.memory_space<vmem>>) attributes {dimension_semantics = [#tpu.dimension_semantics<parallel>], iteration_bounds = array<i64: 2>, scalar_prefetch = 0 : i64, scratch_operands = 0 : i64, tpu.core_type = #tpu.core_type<tc>, window_params = [{transform_indices = @transform_0, window_bounds = array<i64: 1, 8, 128>}, {transform_indices = @transform_1, window_bounds = array<i64: 1, 16, 128>}, {pipeline_mode = #tpu.pipeline_mode<synchronous>, transform_indices = @transform_2, window_bounds = array<i64: 1, 128>}, {pipeline_mode = #tpu.pipeline_mode<synchronous>, transform_indices = @transform_3, window_bounds = array<i64: 1, 128>}, {pipeline_mode = #tpu.pipeline_mode<synchronous>, transform_indices = @transform_4, window_bounds = array<i64: 1, 128>}, {pipeline_mode = #tpu.pipeline_mode<synchronous>, transform_indices = @transform_5, window_bounds = array<i64: 1, 128>}, {pipeline_mode = #tpu.pipeline_mode<synchronous>, transform_indices = @transform_6, window_bounds = array<i64: 128, 512>}, {pipeline_mode = #tpu.pipeline_mode<synchronous>, transform_indices = @transform_7, window_bounds = array<i64: 1, 512>}, {pipeline_mode = #tpu.pipeline_mode<synchronous>, transform_indices = @transform_8, window_bounds = array<i64: 128, 1024>}, {pipeline_mode = #tpu.pipeline_mode<synchronous>, transform_indices = @transform_9, window_bounds = array<i64: 1, 1024>}, {pipeline_mode = #tpu.pipeline_mode<synchronous>, transform_indices = @transform_10, window_bounds = array<i64: 4, 128, 128>}, {pipeline_mode = #tpu.pipeline_mode<synchronous>, transform_indices = @transform_11, window_bounds = array<i64: 1, 128>}, {transform_indices = @transform_12, window_bounds = array<i64: 1, 8, 128>}]} {
    %c0 = arith.constant 0 : index
    %c0_0 = arith.constant 0 : index
    %c0_1 = arith.constant 0 : index
    %0 = vector.load %arg1[%c0, %c0_0, %c0_1] : memref<1x8x128xf32, #tpu.memory_space<vmem>>, vector<1x8x128xf32>
    %1 = vector.shape_cast %0 : vector<1x8x128xf32> to vector<8x128xf32>
    %c0_2 = arith.constant 0 : index
    %c0_3 = arith.constant 0 : index
    %c0_4 = arith.constant 0 : index
    %2 = vector.load %arg2[%c0_2, %c0_3, %c0_4] : memref<1x16x128xf32, #tpu.memory_space<vmem>>, vector<1x16x128xf32>
    %3 = vector.shape_cast %2 : vector<1x16x128xf32> to vector<16x128xf32>
    %c0_5 = arith.constant 0 : index
    %c0_6 = arith.constant 0 : index
    %4 = vector.load %arg3[%c0_5, %c0_6] : memref<1x128xf32, #tpu.memory_space<vmem>>, vector<1x128xf32>
    %c0_7 = arith.constant 0 : index
    %c0_8 = arith.constant 0 : index
    %5 = vector.load %arg4[%c0_7, %c0_8] : memref<1x128xf32, #tpu.memory_space<vmem>>, vector<1x128xf32>
    %cst = arith.constant dense<0.000000e+00> : vector<8xf32>
    %6 = vector.multi_reduction <add>, %1, %cst [1] : vector<8x128xf32> to vector<8xf32>
    %7 = vector.shape_cast %6 : vector<8xf32> to vector<8x1xf32>
    %cst_9 = arith.constant 3.125000e-02 : f32
    %8 = vector.broadcast %cst_9 : f32 to vector<8x1xf32>
    %9 = arith.mulf %7, %8 : vector<8x1xf32>
    %10 = arith.mulf %1, %1 : vector<8x128xf32>
    %cst_10 = arith.constant dense<0.000000e+00> : vector<8xf32>
    %11 = vector.multi_reduction <add>, %10, %cst_10 [1] : vector<8x128xf32> to vector<8xf32>
    %12 = vector.shape_cast %11 : vector<8xf32> to vector<8x1xf32>
    %cst_11 = arith.constant 3.125000e-02 : f32
    %13 = vector.broadcast %cst_11 : f32 to vector<8x1xf32>
    %14 = arith.mulf %12, %13 : vector<8x1xf32>
    %15 = arith.mulf %9, %9 : vector<8x1xf32>
    %16 = arith.subf %14, %15 : vector<8x1xf32>
    %17 = vector.broadcast %9 : vector<8x1xf32> to vector<8x128xf32>
    %18 = arith.subf %1, %17 : vector<8x128xf32>
    %cst_12 = arith.constant 9.99999974E-6 : f32
    %19 = vector.broadcast %cst_12 : f32 to vector<8x1xf32>
    %20 = arith.addf %16, %19 : vector<8x1xf32>
    %21 = math.rsqrt %20 : vector<8x1xf32>
    %22 = vector.broadcast %21 : vector<8x1xf32> to vector<8x128xf32>
    %23 = arith.mulf %18, %22 : vector<8x128xf32>
    %24 = vector.broadcast %4 : vector<1x128xf32> to vector<8x128xf32>
    %25 = arith.mulf %23, %24 : vector<8x128xf32>
    %26 = vector.broadcast %5 : vector<1x128xf32> to vector<8x128xf32>
    %27 = arith.addf %25, %26 : vector<8x128xf32>
    %c0_13 = arith.constant 0 : index
    %c0_14 = arith.constant 0 : index
    %28 = vector.load %arg5[%c0_13, %c0_14] : memref<1x128xf32, #tpu.memory_space<vmem>>, vector<1x128xf32>
    %c0_15 = arith.constant 0 : index
    %c0_16 = arith.constant 0 : index
    %29 = vector.load %arg6[%c0_15, %c0_16] : memref<1x128xf32, #tpu.memory_space<vmem>>, vector<1x128xf32>
    %cst_17 = arith.constant dense<0.000000e+00> : vector<16xf32>
    %30 = vector.multi_reduction <add>, %3, %cst_17 [1] : vector<16x128xf32> to vector<16xf32>
    %31 = vector.shape_cast %30 : vector<16xf32> to vector<16x1xf32>
    %cst_18 = arith.constant 0.0416666679 : f32
    %32 = vector.broadcast %cst_18 : f32 to vector<16x1xf32>
    %33 = arith.mulf %31, %32 : vector<16x1xf32>
    %34 = arith.mulf %3, %3 : vector<16x128xf32>
    %cst_19 = arith.constant dense<0.000000e+00> : vector<16xf32>
    %35 = vector.multi_reduction <add>, %34, %cst_19 [1] : vector<16x128xf32> to vector<16xf32>
    %36 = vector.shape_cast %35 : vector<16xf32> to vector<16x1xf32>
    %cst_20 = arith.constant 0.0416666679 : f32
    %37 = vector.broadcast %cst_20 : f32 to vector<16x1xf32>
    %38 = arith.mulf %36, %37 : vector<16x1xf32>
    %39 = arith.mulf %33, %33 : vector<16x1xf32>
    %40 = arith.subf %38, %39 : vector<16x1xf32>
    %41 = vector.broadcast %33 : vector<16x1xf32> to vector<16x128xf32>
    %42 = arith.subf %3, %41 : vector<16x128xf32>
    %cst_21 = arith.constant 9.99999974E-6 : f32
    %43 = vector.broadcast %cst_21 : f32 to vector<16x1xf32>
    %44 = arith.addf %40, %43 : vector<16x1xf32>
    %45 = math.rsqrt %44 : vector<16x1xf32>
    %46 = vector.broadcast %45 : vector<16x1xf32> to vector<16x128xf32>
    %47 = arith.mulf %42, %46 : vector<16x128xf32>
    %48 = vector.broadcast %28 : vector<1x128xf32> to vector<16x128xf32>
    %49 = arith.mulf %47, %48 : vector<16x128xf32>
    %50 = vector.broadcast %29 : vector<1x128xf32> to vector<16x128xf32>
    %51 = arith.addf %49, %50 : vector<16x128xf32>
    %52 = arith.truncf %27 : vector<8x128xf32> to vector<8x128xbf16>
    %c0_22 = arith.constant 0 : index
    %c0_23 = arith.constant 0 : index
    %53 = vector.load %arg7[%c0_22, %c0_23] : memref<128x512xbf16, #tpu.memory_space<vmem>>, vector<128x512xbf16>
    %cst_24 = arith.constant dense<0.000000e+00> : vector<8x512xf32>
    %54 = tpu.matmul %52, %53, %cst_24 {dimension_numbers = #tpu.dot_dimension_numbers<[1], [0], [0], [1], [0, 0, 1, 1], [], []>} : vector<8x128xbf16>, vector<128x512xbf16>, vector<8x512xf32> -> vector<8x512xf32>
    %c0_25 = arith.constant 0 : index
    %c0_26 = arith.constant 0 : index
    %55 = vector.load %arg8[%c0_25, %c0_26] : memref<1x512xf32, #tpu.memory_space<vmem>>, vector<1x512xf32>
    %56 = vector.broadcast %55 : vector<1x512xf32> to vector<8x512xf32>
    %57 = arith.addf %54, %56 : vector<8x512xf32>
    %58 = arith.truncf %51 : vector<16x128xf32> to vector<16x128xbf16>
    %c0_27 = arith.constant 0 : index
    %c0_28 = arith.constant 0 : index
    %59 = vector.load %arg9[%c0_27, %c0_28] : memref<128x1024xbf16, #tpu.memory_space<vmem>>, vector<128x1024xbf16>
    %cst_29 = arith.constant dense<0.000000e+00> : vector<16x1024xf32>
    %60 = tpu.matmul %58, %59, %cst_29 {dimension_numbers = #tpu.dot_dimension_numbers<[1], [0], [0], [1], [0, 0, 1, 1], [], []>} : vector<16x128xbf16>, vector<128x1024xbf16>, vector<16x1024xf32> -> vector<16x1024xf32>
    %c0_30 = arith.constant 0 : index
    %c0_31 = arith.constant 0 : index
    %61 = vector.load %arg10[%c0_30, %c0_31] : memref<1x1024xf32, #tpu.memory_space<vmem>>, vector<1x1024xf32>
    %62 = vector.broadcast %61 : vector<1x1024xf32> to vector<16x1024xf32>
    %63 = arith.addf %60, %62 : vector<16x1024xf32>
    %64 = vector.shape_cast %57 : vector<8x512xf32> to vector<1x8x512xf32>
    %65 = vector.shape_cast %63 : vector<16x1024xf32> to vector<1x16x1024xf32>
    %66 = vector.shape_cast %64 : vector<1x8x512xf32> to vector<8x512xf32>
    %67 = vector.shape_cast %65 : vector<1x16x1024xf32> to vector<16x1024xf32>
    %68 = vector.extract_strided_slice %66 {offsets = [0, 0], sizes = [8, 128], strides = [1, 1]} : vector<8x512xf32> to vector<8x128xf32>
    %69 = vector.extract_strided_slice %66 {offsets = [0, 128], sizes = [8, 128], strides = [1, 1]} : vector<8x512xf32> to vector<8x128xf32>
    %70 = vector.extract_strided_slice %66 {offsets = [0, 256], sizes = [8, 128], strides = [1, 1]} : vector<8x512xf32> to vector<8x128xf32>
    %71 = vector.extract_strided_slice %66 {offsets = [0, 384], sizes = [8, 128], strides = [1, 1]} : vector<8x512xf32> to vector<8x128xf32>
    %72 = vector.shape_cast %68 : vector<8x128xf32> to vector<1x8x128xf32>
    %73 = vector.shape_cast %69 : vector<8x128xf32> to vector<1x8x128xf32>
    %74 = vector.shape_cast %70 : vector<8x128xf32> to vector<1x8x128xf32>
    %75 = vector.shape_cast %71 : vector<8x128xf32> to vector<1x8x128xf32>
    %76 = tpu.concatenate %72, %73, %74, %75 in 0 : vector<1x8x128xf32>, vector<1x8x128xf32>, vector<1x8x128xf32>, vector<1x8x128xf32> -> vector<4x8x128xf32>
    %77 = arith.truncf %76 : vector<4x8x128xf32> to vector<4x8x128xbf16>
    %78 = vector.extract_strided_slice %67 {offsets = [0, 0], sizes = [16, 128], strides = [1, 1]} : vector<16x1024xf32> to vector<16x128xf32>
    %79 = vector.extract_strided_slice %67 {offsets = [0, 128], sizes = [16, 128], strides = [1, 1]} : vector<16x1024xf32> to vector<16x128xf32>
    %80 = vector.extract_strided_slice %67 {offsets = [0, 256], sizes = [16, 128], strides = [1, 1]} : vector<16x1024xf32> to vector<16x128xf32>
    %81 = vector.extract_strided_slice %67 {offsets = [0, 384], sizes = [16, 128], strides = [1, 1]} : vector<16x1024xf32> to vector<16x128xf32>
    %82 = vector.shape_cast %78 : vector<16x128xf32> to vector<1x16x128xf32>
    %83 = vector.shape_cast %79 : vector<16x128xf32> to vector<1x16x128xf32>
    %84 = vector.shape_cast %80 : vector<16x128xf32> to vector<1x16x128xf32>
    %85 = vector.shape_cast %81 : vector<16x128xf32> to vector<1x16x128xf32>
    %86 = tpu.concatenate %82, %83, %84, %85 in 0 : vector<1x16x128xf32>, vector<1x16x128xf32>, vector<1x16x128xf32>, vector<1x16x128xf32> -> vector<4x16x128xf32>
    %87 = arith.truncf %86 : vector<4x16x128xf32> to vector<4x16x128xbf16>
    %88 = vector.extract_strided_slice %67 {offsets = [0, 512], sizes = [16, 128], strides = [1, 1]} : vector<16x1024xf32> to vector<16x128xf32>
    %89 = vector.extract_strided_slice %67 {offsets = [0, 640], sizes = [16, 128], strides = [1, 1]} : vector<16x1024xf32> to vector<16x128xf32>
    %90 = vector.extract_strided_slice %67 {offsets = [0, 768], sizes = [16, 128], strides = [1, 1]} : vector<16x1024xf32> to vector<16x128xf32>
    %91 = vector.extract_strided_slice %67 {offsets = [0, 896], sizes = [16, 128], strides = [1, 1]} : vector<16x1024xf32> to vector<16x128xf32>
    %92 = vector.shape_cast %88 : vector<16x128xf32> to vector<1x16x128xf32>
    %93 = vector.shape_cast %89 : vector<16x128xf32> to vector<1x16x128xf32>
    %94 = vector.shape_cast %90 : vector<16x128xf32> to vector<1x16x128xf32>
    %95 = vector.shape_cast %91 : vector<16x128xf32> to vector<1x16x128xf32>
    %96 = tpu.concatenate %92, %93, %94, %95 in 0 : vector<1x16x128xf32>, vector<1x16x128xf32>, vector<1x16x128xf32>, vector<1x16x128xf32> -> vector<4x16x128xf32>
    %97 = arith.truncf %96 : vector<4x16x128xf32> to vector<4x16x128xbf16>
    "tpu.trace_start"() <{level = 10 : i32, message = "hqd,hkd->hqk"}> : () -> ()
    %cst_32 = arith.constant dense<0.000000e+00> : vector<4x8x16xf32>
    %98 = tpu.matmul %77, %87, %cst_32 {dimension_numbers = #tpu.dot_dimension_numbers<[2], [2], [1], [1], [0, 0, 0, 1, 1, 1], [0], [0]>} : vector<4x8x128xbf16>, vector<4x16x128xbf16>, vector<4x8x16xf32> -> vector<4x8x16xf32>
    "tpu.trace_stop"() : () -> ()
    %cst_33 = arith.constant 0.353553385 : f32
    %99 = vector.broadcast %cst_33 : f32 to vector<4x8x16xf32>
    %100 = arith.mulf %98, %99 : vector<4x8x16xf32>
    %cst_34 = arith.constant dense<0xFF800000> : vector<4x8xf32>
    %101 = vector.multi_reduction <maximumf>, %100, %cst_34 [2] : vector<4x8x16xf32> to vector<4x8xf32>
    %102 = vector.shape_cast %101 : vector<4x8xf32> to vector<4x8x1xf32>
    %103 = vector.broadcast %102 : vector<4x8x1xf32> to vector<4x8x16xf32>
    %104 = arith.subf %100, %103 : vector<4x8x16xf32>
    %105 = math.exp %104 : vector<4x8x16xf32>
    %cst_35 = arith.constant dense<0.000000e+00> : vector<4x8xf32>
    %106 = vector.multi_reduction <add>, %105, %cst_35 [2] : vector<4x8x16xf32> to vector<4x8xf32>
    %107 = vector.shape_cast %106 : vector<4x8xf32> to vector<4x8x1xf32>
    %108 = tpu.reciprocal %107 {approx = true} : vector<4x8x1xf32> -> vector<4x8x1xf32>
    %109 = vector.broadcast %108 : vector<4x8x1xf32> to vector<4x8x16xf32>
    %110 = arith.mulf %105, %109 : vector<4x8x16xf32>
    %111 = arith.truncf %110 : vector<4x8x16xf32> to vector<4x8x16xbf16>
    "tpu.trace_start"() <{level = 10 : i32, message = "hqk,hkd->hqd"}> : () -> ()
    %cst_36 = arith.constant dense<0.000000e+00> : vector<4x8x128xf32>
    %112 = tpu.matmul %111, %97, %cst_36 {dimension_numbers = #tpu.dot_dimension_numbers<[2], [1], [1], [2], [0, 0, 0, 1, 1, 2], [0], [0]>} : vector<4x8x16xbf16>, vector<4x16x128xbf16>, vector<4x8x128xf32> -> vector<4x8x128xf32>
    "tpu.trace_stop"() : () -> ()
    %113 = arith.truncf %112 : vector<4x8x128xf32> to vector<4x8x128xbf16>
    %c0_37 = arith.constant 0 : index
    %c0_38 = arith.constant 0 : index
    %c0_39 = arith.constant 0 : index
    %114 = vector.load %arg11[%c0_37, %c0_38, %c0_39] : memref<4x128x128xbf16, #tpu.memory_space<vmem>>, vector<4x128x128xbf16>
    "tpu.trace_start"() <{level = 10 : i32, message = "hqd,hdn->hqn"}> : () -> ()
    %cst_40 = arith.constant dense<0.000000e+00> : vector<4x8x128xf32>
    %115 = tpu.matmul %113, %114, %cst_40 {dimension_numbers = #tpu.dot_dimension_numbers<[2], [1], [1], [2], [0, 0, 0, 1, 1, 2], [0], [0]>} : vector<4x8x128xbf16>, vector<4x128x128xbf16>, vector<4x8x128xf32> -> vector<4x8x128xf32>
    "tpu.trace_stop"() : () -> ()
    %cst_41 = arith.constant dense<0.000000e+00> : vector<8x128xf32>
    %116 = vector.multi_reduction <add>, %115, %cst_41 [0] : vector<4x8x128xf32> to vector<8x128xf32>
    %c0_42 = arith.constant 0 : index
    %c0_43 = arith.constant 0 : index
    %117 = vector.load %arg12[%c0_42, %c0_43] : memref<1x128xf32, #tpu.memory_space<vmem>>, vector<1x128xf32>
    %118 = vector.broadcast %117 : vector<1x128xf32> to vector<8x128xf32>
    %119 = arith.addf %116, %118 : vector<8x128xf32>
    %c0_44 = arith.constant 0 : index
    %c0_45 = arith.constant 0 : index
    %c0_46 = arith.constant 0 : index
    %120 = vector.load %arg13[%c0_44, %c0_45, %c0_46] : memref<1x8x128xf32, #tpu.memory_space<vmem>>, vector<1x8x128xf32>
    %121 = vector.shape_cast %120 : vector<1x8x128xf32> to vector<8x128xf32>
    %122 = vector.shape_cast %119 : vector<8x128xf32> to vector<1x8x128xf32>
    tpu.vector_store %arg13[%c0_44, %c0_45, %c0_46], %122 {strides = array<i32>} : memref<1x8x128xf32, #tpu.memory_space<vmem>>, vector<1x8x128xf32>,
    return
  }
  func.func @transform_0(%arg0: i32) -> (i32, i32, i32) {
    %c0_i32 = arith.constant 0 : i32
    %c0_i32_0 = arith.constant 0 : i32
    %c0_i32_1 = arith.constant 0 : i32
    return %arg0, %c0_i32, %c0_i32_0 : i32, i32, i32
  }
  func.func @transform_1(%arg0: i32) -> (i32, i32, i32) {
    %c0_i32 = arith.constant 0 : i32
    %c0_i32_0 = arith.constant 0 : i32
    %c0_i32_1 = arith.constant 0 : i32
    return %arg0, %c0_i32, %c0_i32_0 : i32, i32, i32
  }
  func.func @transform_2(%arg0: i32) -> (i32, i32) {
    %c0_i32 = arith.constant 0 : i32
    %c0_i32_0 = arith.constant 0 : i32
    %c0_i32_1 = arith.constant 0 : i32
    return %c0_i32, %c0_i32_0 : i32, i32
  }
  func.func @transform_3(%arg0: i32) -> (i32, i32) {
    %c0_i32 = arith.constant 0 : i32
    %c0_i32_0 = arith.constant 0 : i32
    %c0_i32_1 = arith.constant 0 : i32
    return %c0_i32, %c0_i32_0 : i32, i32
  }
  func.func @transform_4(%arg0: i32) -> (i32, i32) {
    %c0_i32 = arith.constant 0 : i32
    %c0_i32_0 = arith.constant 0 : i32
    %c0_i32_1 = arith.constant 0 : i32
    return %c0_i32, %c0_i32_0 : i32, i32
  }
  func.func @transform_5(%arg0: i32) -> (i32, i32) {
    %c0_i32 = arith.constant 0 : i32
    %c0_i32_0 = arith.constant 0 : i32
    %c0_i32_1 = arith.constant 0 : i32
    return %c0_i32, %c0_i32_0 : i32, i32
  }
  func.func @transform_6(%arg0: i32) -> (i32, i32) {
    %c0_i32 = arith.constant 0 : i32
    %c0_i32_0 = arith.constant 0 : i32
    %c0_i32_1 = arith.constant 0 : i32
    return %c0_i32, %c0_i32_0 : i32, i32
  }
  func.func @transform_7(%arg0: i32) -> (i32, i32) {
    %c0_i32 = arith.constant 0 : i32
    %c0_i32_0 = arith.constant 0 : i32
    %c0_i32_1 = arith.constant 0 : i32
    return %c0_i32, %c0_i32_0 : i32, i32
  }
  func.func @transform_8(%arg0: i32) -> (i32, i32) {
    %c0_i32 = arith.constant 0 : i32
    %c0_i32_0 = arith.constant 0 : i32
    %c0_i32_1 = arith.constant 0 : i32
    return %c0_i32, %c0_i32_0 : i32, i32
  }
  func.func @transform_9(%arg0: i32) -> (i32, i32) {
    %c0_i32 = arith.constant 0 : i32
    %c0_i32_0 = arith.constant 0 : i32
    %c0_i32_1 = arith.constant 0 : i32
    return %c0_i32, %c0_i32_0 : i32, i32
  }
  func.func @transform_10(%arg0: i32) -> (i32, i32, i32) {
    %c0_i32 = arith.constant 0 : i32
    %c0_i32_0 = arith.constant 0 : i32
    %c0_i32_1 = arith.constant 0 : i32
    %c0_i32_2 = arith.constant 0 : i32
    return %c0_i32, %c0_i32_0, %c0_i32_1 : i32, i32, i32
  }
  func.func @transform_11(%arg0: i32) -> (i32, i32) {
    %c0_i32 = arith.constant 0 : i32
    %c0_i32_0 = arith.constant 0 : i32
    %c0_i32_1 = arith.constant 0 : i32
    return %c0_i32, %c0_i32_0 : i32, i32
  }
  func.func @transform_12(%arg0: i32) -> (i32, i32, i32) {
    %c0_i32 = arith.constant 0 : i32
    %c0_i32_0 = arith.constant 0 : i32
    %c0_i32_1 = arith.constant 0 : i32
    return %arg0, %c0_i32, %c0_i32_0 : i32, i32, i32
  }
}

</mosaic_0001>

<bundles_post_ra>
// kernel: tpu_custom_call.1
= control target key start
LH: loop header
LB: loop body
LE: loop exit
PB: predicated region body
PF: predicated region fallthrough
CT: control target
= control target key end

     0   :  { %s3772_s0 = inlined_call_operand.hbm [shape: f32[2,8,128], index: 0, kind: input, shape index: {}]   ;;  %s3773_s1 = inlined_call_operand.hbm [shape: f32[2,16,128], index: 1, kind: input, shape index: {}]   ;;  %s3774_s2 = inlined_call_operand.vmem [shape: f32[1,128], index: 2, kind: input, shape index: {}]   ;;  %s3775_s3 = inlined_call_operand.vmem [shape: f32[1,128], index: 3, kind: input, shape index: {}]   ;;  %s3776_s4 = inlined_call_operand.vmem [shape: f32[1,128], index: 4, kind: input, shape index: {}]   ;;  %s3777_s5 = inlined_call_operand.vmem [shape: f32[1,128], index: 5, kind: input, shape index: {}]   ;;  %s3778_s6 = inlined_call_operand.hbm [shape: bf16[128,512], index: 6, kind: input, shape index: {}]   ;;  %s3779_s7 = inlined_call_operand.vmem [shape: f32[1,512], index: 7, kind: input, shape index: {}]   ;;  %s3780_s8 = inlined_call_operand.hbm [shape: bf16[128,1024], index: 8, kind: input, shape index: {}]   ;;  %s3781_s9 = inlined_call_operand.vmem [shape: f32[1,1024], index: 9, kind: input, shape index: {}]   ;;  %s3782_s10 = inlined_call_operand.hbm [shape: bf16[4,128,128], index: 10, kind: input, shape index: {}]   ;;  %s3783_s11 = inlined_call_operand.vmem [shape: f32[1,128], index: 11, kind: input, shape index: {}]   ;;  %s3784_s12 = inlined_call_operand.hbm [shape: f32[2,8,128], index: 12, kind: output, shape index: {}]  }
   0x1   :  { %3791 = sst [smem:[#allocation19_spill]] %s3772_s0 }
   0x2   :  { %3792 = sst [smem:[#allocation20_spill]] %s3778_s6 }
   0x3   :  { %3793 = sst [smem:[#allocation21_spill]] %s3779_s7 }
   0x4   :  { %3794 = sst [smem:[#allocation22_spill]] %s3780_s8 }
   0x5   :  { %3795 = sst [smem:[#allocation23_spill]] %s3783_s11 }
   0x6   :  { %3796 = sst [smem:[#allocation24_spill]] %s3784_s12 }
   0x7   :  { %17 = vsyncpa [#allocation3], 0 }
   0x8   :  { %19 = vsyncpa [#allocation3 + $0x1], 0 }
   0x9   :  { %20 = vsyncpa [#allocation6], 0 }
   0xa   :  { %22 = vsyncpa [#allocation6 + $0x1], 0 }
   0xb   :  { %23 = vsyncpa [#allocation9], 0 }
   0xc   :  { %24 = vsyncpa [#allocation4], 0 }
   0xd   :  { %26 = vsyncpa [#allocation4 + $0x1], 0  ;;  %s3290_s21 = smov 0   ;;  %s3292_s22 = smov 0  }
   0xe   :  { %s3294_s23 = smov 0   ;;  %s3296_s24 = smov 0  }
   0xf LB: > { %3797 = sst [smem:[#allocation17_spill]] %s3194_s21  ;;  %s3311_s25 = sadd.s32 4294967295, %s3206_s24   ;;  %s3206_s24 = sphi %s3296_s24, %s3826_s24   ;;  %s3202_s23 = sphi %s3294_s23, %s3825_s23   ;;  %s3198_s22 = sphi %s3292_s22, %s3824_s22   ;;  %s3194_s21 = sphi %s3290_s21, %s3823_s21  }
  0x10   : > { %s2449_s26 = sadd.s32 4294967294, %s3206_s24   ;;  %p52_p0 = scmp.ne.s32.totalorder %s3198_s22, %s3194_s21 }
  0x11   : > { %p3786_p1 = scmp.eq.s32.totalorder %s3311_s25, 0  ;;  %p318_p3 = scmp.eq.s32.totalorder %s2449_s26, 1 }
  0x12   : > { %p2450_p5 = scmp.ge.s32.totalorder %s3206_s24, 1  ;;  %p325_p7 = scmp.lt.s32.totalorder %s3206_s24, 3 }
  0x13   : > { %p3320_p4 = por %p3786_p1, %p52_p0  ;;  %p3325_p6 = por %p318_p3, %p52_p0 }
  0x14   : > { %p3330_p8 = pnand %p2450_p5, %p325_p7  ;;  %s3208_s30 = smov [#allocation7]  }
  0x15   : > { %s3798_s27 = scalar_select %p3320_p4, 1, 0 }
  0x16   : > { %s3799_s28 = scalar_select %p3325_p6, 1, 0 }
  0x17   : > { %s3801_s29 = scalar_select %p3330_p8, 1, 0 }
  0x18   : > { %3800 = sst [smem:[#allocation18_spill]] %s3799_s28  ;;  %s349_s13 = sshll.u32 %s3208_s30, 4  ;;  %s3334_s13 = int_to_ptr.vmem [resolvable:$true] %s349_s13 }
  0x19   : > { %p2807_p9 = pneg %p3330_p8  ;;  %s3209_s15 = smov [#allocation8]  }
  0x1a   : > { %s365_s16 = sshll.u32 %s3209_s15, 4  ;;  %s3803_s6 = sld [smem:[#allocation20_spill]]  ;;  %s3345_s16 = int_to_ptr.vmem [resolvable:$true] %s365_s16 }
  0x1b   : > { %p3341_p11 = pnand %p2807_p9, %p3786_p1 }
  0x1d   : > { %p3355_p13 = pneg %p3341_p11 }
  0x20   : > { %s2984_s19 = scalar_lea.hbm %s3803_s6, 4096 }
  0x21   : > { %p2985_p12 = scmp.ne.s32.totalorder %s3803_s6, %s2984_s19  ;;  %p2991_p5 = scmp.lt.u32.totalorder %s2984_s19, %s3803_s6 }
  0x23   : > { %p2987_p0 = pnand %p3355_p13, %p2985_p12 }
  0x25   : > { %p2988_p3 = pneg %p2987_p0 }
  0x27   : > { %p2993_p7 = pnand %p2991_p5, %p2988_p3 }
  0x29   : > { %2996 = shalt.err (!%p2993_p7)
}
  0x2a   : > { %s2997_s17 = scalar_lea.vmem %s3334_s13, 4096  ;;  %p3005_p2 = scmp.lt.s32.totalorder %s3334_s13, %s3334_s13 }
  0x2b   : > { %p2998_p9 = scmp.ne.s32.totalorder %s3334_s13, %s2997_s17  ;;  %p3006_p6 = scmp.lt.s32.totalorder %s2997_s17, %s2997_s17 }
  0x2d   : > { %p3000_p10 = pnand %p2998_p9, %p3355_p13  ;;  %p3007_p12 = por %p3006_p6, %p3005_p2 }
  0x2f   : > { %p3001_p1 = pneg %p3000_p10 }
  0x31   : > { %p3008_p0 = pnand %p3007_p12, %p3001_p1 }
  0x33   : > { %3011 = shalt.err (!%p3008_p0)
}
  0x34   : > { %s3210_s18 = smov 256   ;;  %s3211_s28 = smov 16  }
  0x35   : > { %2810 = dma.hbm_to_vmem [thread:$0]  (!%p3341_p11), %s3803_s6, 4096, %s3334_s13, [#allocation6], %s3210_s18, %s3210_s18, %s3211_s28  }
  0x36   : > { %s3805_s8 = sld [smem:[#allocation22_spill]] }
  0x3c   : > { %s3012_s21 = scalar_lea.hbm %s3805_s8, 8192 }
  0x3d   : > { %p3013_p2 = scmp.ne.s32.totalorder %s3805_s8, %s3012_s21  ;;  %p3019_p10 = scmp.lt.u32.totalorder %s3012_s21, %s3805_s8 }
  0x3f   : > { %p3015_p1 = pnand %p3013_p2, %p3355_p13 }
  0x41   : > { %p3016_p6 = pneg %p3015_p1 }
  0x43   : > { %p3021_p3 = pnand %p3019_p10, %p3016_p6 }
  0x45   : > { %3024 = shalt.err (!%p3021_p3)
}
  0x46   : > { %s3025_s13 = scalar_lea.vmem %s3345_s16, 8192  ;;  %p3033_p12 = scmp.lt.s32.totalorder %s3345_s16, %s3345_s16 }
  0x47   : > { %p3026_p5 = scmp.ne.s32.totalorder %s3345_s16, %s3025_s13  ;;  %p3034_p0 = scmp.lt.s32.totalorder %s3025_s13, %s3025_s13 }
  0x49   : > { %p3028_p7 = pnand %p3026_p5, %p3355_p13  ;;  %p3035_p2 = por %p3034_p0, %p3033_p12 }
  0x4b   : > { %p3029_p9 = pneg %p3028_p7 }
  0x4d   : > { %p3036_p1 = pnand %p3035_p2, %p3029_p9 }
  0x4f   : > { %3039 = shalt.err (!%p3036_p1)
}
  0x50   : > { %s3212_s11 = smov 512   ;;  %s3213_s7 = smov 32  }
  0x51   : > { %2813 = dma.hbm_to_vmem [thread:$0]  (!%p3341_p11), %s3805_s8, 8192, %s3345_s16, [#allocation9], %s3212_s11, %s3212_s11, %s3213_s7  }
  0x52   : > { %s3214_s18 = smov [#allocation10]   ;;  %s3040_s26 = scalar_lea.hbm %s3782_s10, 4096 }
  0x53   : > { %s381_s28 = sshll.u32 %s3214_s18, 4  ;;  %p3041_p6 = scmp.ne.s32.totalorder %s3782_s10, %s3040_s26  ;;  %s382_s28 = int_to_ptr.vmem [resolvable:$true] %s381_s28 }
  0x54   : > { %p3047_p5 = scmp.lt.u32.totalorder %s3040_s26, %s3782_s10 }
  0x55   : > { %p3043_p10 = pnand %p3041_p6, %p3355_p13 }
  0x57   : > { %p3044_p3 = pneg %p3043_p10 }
  0x59   : > { %p3049_p7 = pnand %p3047_p5, %p3044_p3 }
  0x5b   : > { %3052 = shalt.err (!%p3049_p7)
}
  0x5c   : > { %s3053_s16 = scalar_lea.vmem %s382_s28, 4096  ;;  %p3061_p2 = scmp.lt.s32.totalorder %s382_s28, %s382_s28 }
  0x5d   : > { %p3054_p9 = scmp.ne.s32.totalorder %s382_s28, %s3053_s16  ;;  %p3062_p1 = scmp.lt.s32.totalorder %s3053_s16, %s3053_s16 }
  0x5f   : > { %p3056_p12 = pnand %p3054_p9, %p3355_p13  ;;  %p3063_p4 = por %p3062_p1, %p3061_p2 }
  0x61   : > { %p3057_p0 = pneg %p3056_p12 }
  0x63   : > { %p3064_p8 = pnand %p3063_p4, %p3057_p0 }
  0x65   : > { %3067 = shalt.err (!%p3064_p8)
}
  0x66   : > { %s3215_s11 = smov 64   ;;  %s3216_s6 = smov 4  }
  0x67   : > { %2816 = dma.hbm_to_vmem [thread:$0]  (!%p3341_p11), %s3782_s10, 4096, %s382_s28, [#allocation9], %s3215_s11, %s3215_s11, %s3216_s6  }
  0x68   : > { %s3418_s12 = sadd.s32 1, %s3206_s24   ;;  %s39_s18 = sadd.s32 1, %s3202_s23 }
  0x69   : > { %s36_s21 = ssub.s32 %s3206_s24, %s3418_s12  ;;  %p46_p8 = scmp.ne.s32.totalorder %s3202_s23, %s3198_s22 }
  0x6a   : > { %p37_p4 = scmp.eq.s32.totalorder %s36_s21, 0  ;;  %p47_p13 = scmp.eq.s32.totalorder %s3206_s24, 0 }
  0x6b   : > { %p2831_p6 = scmp.lt.s32.totalorder %s3206_s24, 2  ;;  %p3806_p3 = scmp.eq.s32.totalorder %s3311_s25, 1 }
  0x6c   : > { %s3428_s19 = scalar_select %p37_p4, %s3202_s23, %s39_s18  }
  0x6d   : > { %p48_p10 = por %p47_p13, %p46_p8  ;;  %p3432_p5 = por %p3806_p3, %p46_p8 }
  0x6e   : > { %s3437_s14 = sand.u32 1, %s3202_s23   ;;  %s2456_s28 = sshll.u32 %s3206_s24, 7 }
  0x6f   : > { %s2455_s26 = sshll.u32 %s3437_s14, 3  ;;  %s3808_s0 = sld [smem:[#allocation19_spill]] }
  0x70   : > { %s402_s16 = scalar_lea.vmem [#allocation2], %s2455_s26  ;;  %p3446_p11 = pnand %p2831_p6, %p48_p10 }
  0x71   : > { %s409_s11 = sshll.u32 %s402_s16, 4  ;;  %s2457_s30 = sshll.u32 %s3437_s14, 4  ;;  %s3450_s11 = int_to_ptr.vmem [resolvable:$true] %s409_s11 }
  0x72   : > { %s399_s7 = scalar_lea.sflag [#allocation3], %s3437_s14  ;;  %p3070_p9 = pneg %p3446_p11 }
  0x75   : > { %s3444_s13 = scalar_lea.hbm %s3808_s0, %s2456_s28  ;;  %s3073_s26 = scalar_lea.hbm %s3808_s0, 256 }
  0x76   : > { %s3068_s21 = scalar_lea.hbm %s3444_s13, 128  ;;  %p3074_p2 = scmp.lt.u32.totalorder %s3444_s13, %s3808_s0 }
  0x77   : > { %p3069_p7 = scmp.ne.s32.totalorder %s3444_s13, %s3068_s21  ;;  %p3075_p1 = scmp.lt.u32.totalorder %s3073_s26, %s3068_s21 }
  0x78   : > { %p3077_p8 = scmp.lt.u32.totalorder %s3068_s21, %s3444_s13 }
  0x79   : > { %p3071_p12 = pnand %p3070_p9, %p3069_p7  ;;  %p3076_p4 = por %p3075_p1, %p3074_p2 }
  0x7b   : > { %p3072_p0 = pneg %p3071_p12  ;;  %p3078_p13 = por %p3077_p8, %p3076_p4 }
  0x7d   : > { %p3079_p6 = pnand %p3078_p13, %p3072_p0 }
  0x7f   : > { %3082 = shalt.err (!%p3079_p6)
}
  0x80   : > { %s3083_s16 = scalar_lea.vmem %s3450_s11, 128  ;;  %s3217_s18 = smov [#allocation2]  }
  0x81   : > { %p3084_p10 = scmp.ne.s32.totalorder %s3450_s11, %s3083_s16  ;;  %s3088_s28 = sshll.u32 %s3217_s18, 4  ;;  %s3089_s28 = int_to_ptr.vmem [resolvable:$false] %s3088_s28 }
  0x82   : > { %s3090_s15 = scalar_lea.vmem %s3089_s28, 256  ;;  %p3091_p12 = scmp.lt.s32.totalorder %s3450_s11, %s3089_s28 }
  0x83   : > { %p3086_p3 = pnand %p3084_p10, %p3070_p9  ;;  %p3092_p2 = scmp.lt.s32.totalorder %s3090_s15, %s3083_s16 }
  0x85   : > { %p3087_p7 = pneg %p3086_p3  ;;  %p3093_p1 = por %p3092_p2, %p3091_p12 }
  0x87   : > { %p3094_p4 = pnand %p3093_p1, %p3087_p7 }
  0x89   : > { %3097 = shalt.err (!%p3094_p4)
}
  0x8a   : > { %2820 = dma.hbm_to_vmem [thread:$0]  (!%p3446_p11), %s3444_s13, 128, %s3450_s11, %s399_s7  }
  0x8b   : > { %s420_s21 = scalar_lea.vmem [#allocation5], %s2457_s30  ;;  %s416_s17 = sand.u32 1, %s3206_s24  }
  0x8c   : > { %s427_s26 = sshll.u32 %s420_s21, 4  ;;  %s2608_s18 = sshll.u32 %s3206_s24, 8  ;;  %s3482_s26 = int_to_ptr.vmem [resolvable:$true] %s427_s26 }
  0x8d   : > { %s3488_s15 = scalar_lea.hbm %s3773_s1, %s2608_s18  ;;  %s3490_s0 = scalar_lea.sflag [#allocation6], %s416_s17 }
  0x8e   : > { %s3098_s8 = scalar_lea.hbm %s3488_s15, 256  ;;  %s3103_s11 = scalar_lea.hbm %s3773_s1, 512 }
  0x8f   : > { %p3099_p0 = scmp.ne.s32.totalorder %s3488_s15, %s3098_s8  ;;  %p3104_p6 = scmp.lt.u32.totalorder %s3488_s15, %s3773_s1 }
  0x90   : > { %p3105_p10 = scmp.lt.u32.totalorder %s3103_s11, %s3098_s8  ;;  %p3107_p7 = scmp.lt.u32.totalorder %s3098_s8, %s3488_s15 }
  0x91   : > { %p3101_p8 = pnand %p3099_p0, %p3070_p9 }
  0x92   : > { %p3106_p3 = por %p3105_p10, %p3104_p6 }
  0x93   : > { %p3102_p13 = pneg %p3101_p8 }
  0x94   : > { %p3108_p12 = por %p3107_p7, %p3106_p3 }
  0x96   : > { %p3109_p2 = pnand %p3108_p12, %p3102_p13 }
  0x98   : > { %3112 = shalt.err (!%p3109_p2)
}
  0x99   : > { %s3113_s21 = scalar_lea.vmem %s3482_s26, 256  ;;  %s3218_s17 = smov [#allocation5]  }
  0x9a   : > { %p3114_p1 = scmp.ne.s32.totalorder %s3482_s26, %s3113_s21  ;;  %s3118_s18 = sshll.u32 %s3218_s17, 4  ;;  %s3119_s18 = int_to_ptr.vmem [resolvable:$false] %s3118_s18 }
  0x9b   : > { %s3120_s16 = scalar_lea.vmem %s3119_s18, 512  ;;  %p3121_p8 = scmp.lt.s32.totalorder %s3482_s26, %s3119_s18 }
  0x9c   : > { %p3116_p4 = pnand %p3114_p1, %p3070_p9  ;;  %p3122_p6 = scmp.lt.s32.totalorder %s3120_s16, %s3113_s21 }
  0x9e   : > { %p3117_p0 = pneg %p3116_p4  ;;  %p3123_p10 = por %p3122_p6, %p3121_p8 }
  0xa0   : > { %p3124_p3 = pnand %p3123_p10, %p3117_p0 }
  0xa2   : > { %3127 = shalt.err (!%p3124_p3)
}
  0xa3   : > { %s3219_s8 = smov 128   ;;  %s3220_s28 = smov 8  }
  0xa4   : > { %2823 = dma.hbm_to_vmem [thread:$0]  (!%p3446_p11), %s3488_s15, 256, %s3482_s26, %s3490_s0, %s3219_s8, %s3219_s8, %s3220_s28  }
  0xa5   : > { %p3810_p9 = scmp.ne.s32.totalorder %s3801_s29, 0 }
  0xa6   : > { %s3519_s14 = sand.u32 (!%p3810_p9), 1, %s3198_s22   ;;  %p3811_p13 = scmp.ne.s32.totalorder (!%p3810_p9), %s3798_s27, 0 }
  0xa7   : > { %439 = sbr.rel (%p3810_p9) target bundleno = 1622 (0x656), region = 68  ;;  %s2461_s13 = sshll.u32 (!%p3810_p9), %s3519_s14, 3 }
  0xa8   : > { %s442_s11 = scalar_lea.sflag (!%p3810_p9), [#allocation3], %s3519_s14  ;;  %s445_s30 = scalar_lea.vmem (!%p3810_p9), [#allocation2], %s2461_s13 }
  0xae   : > { %3173 = dma.done.wait (%p3811_p13), %s442_s11, 128  }
  0xaf   : > { %3175 = vsyncadd (%p3811_p13), %s442_s11, 4294967168  ;;  %s450_s0 = sand.u32 1, %s3311_s25   ;;  %s2462_s29 = sshll.u32 %s3519_s14, 4 }
  0xb0   : > { %s451_s6 = scalar_lea.sflag [#allocation6], %s450_s0  ;;  %s454_s26 = scalar_lea.vmem [#allocation5], %s2462_s29 }
  0xb1   : > { %3177 = dma.done.wait (%p3811_p13), %s451_s6, 256  }
  0xb2   : > { %3179 = vsyncadd (%p3811_p13), %s451_s6, 4294967040  ;;  %p3812_p11 = scmp.eq.s32.totalorder %s3311_s25, 0 }
  0xb4   : > { %3181 = dma.done.wait (%p3812_p11), [#allocation6], 4096   ;;  %p3813_p7 = pmov %p3812_p11 }
  0xb6   : > { %3183 = vsyncadd (%p3813_p7), [#allocation6], 4294963200  ;;  %p3814_p12 = pmov %p3813_p7 }
  0xb7   : > { %p3815_p2 = pmov %p3813_p7 }
  0xb8   : > { %3185 = dma.done.wait (%p3814_p12), [#allocation9], 12288  }
  0xb9   : > { %3187 = vsyncadd (%p3815_p2), [#allocation9], 4294955008  ;;  %v3543_v0 = vld [vmem:[%s445_s30] sm:$0xff]  ;;  %v3545_v1 = vld [vmem:[%s454_s26] sm:$0xff]  ;;  %v3221_v39 = vmov 0   ;;  %vm3223_vm0 = vmmov 0  }
  0xba   : > { %v3547_v2 = vld [vmem:[%s454_s26 + $0x8] sm:$0xff]  ;;  %518 = vadd.xlane.f32.xlu0 %v3543_v0  ;;  %v521_v3 = vmul.f32 %v3543_v0, %v3543_v0  ;;  %547 = vadd.xlane.f32.xlu1 %v3545_v1  ;;  %v2882_v4 = vld [vmem:[#allocation7 + $0x4] ss:$16 sps:$4 sm:$0xff]   ;;  %v2886_v6 = vld [vmem:[#allocation7] ss:$16 sps:$4 sm:$0xff]   ;;  %v553_v9 = vmul.f32 %v3545_v1, %v3545_v1  ;;  %s3816_s29 = sld [smem:[#allocation21_spill]] }
  0xbb   : > { %v2884_v5 = vld [vmem:[#allocation7 + $0xc] ss:$16 sps:$4 sm:$0xff]   ;;  %804 = vmatprep.subr.bf16.mxu0 %v2882_v4  ;;  %v2887_v7 = vld [vmem:[#allocation7 + $0x8] ss:$16 sps:$4 sm:$0xff]   ;;  %v554_v8 = vmul.f32 %v3547_v2, %v3547_v2  ;;  %v2888_v10 = vld [vmem:[#allocation7 + $0x24] ss:$16 sps:$4 sm:$0xff]   ;;  %836 = vmatprep.mubr.bf16.mxu0 %v3221_v39 }
  0xbc   : > { %845 = vmatprep.subr.bf16.mxu1 %v2884_v5  ;;  %805 = vmatpush1.bf16.msra.mxu0 %v2886_v6  ;;  %v2890_v11 = vld [vmem:[#allocation7 + $0x2c] ss:$16 sps:$4 sm:$0xff]   ;;  %v2892_v12 = vld [vmem:[#allocation7 + $0x20] ss:$16 sps:$4 sm:$0xff]   ;;  %v2893_v13 = vld [vmem:[#allocation7 + $0x28] ss:$16 sps:$4 sm:$0xff]  }
  0xbd   : > { %846 = vmatpush1.bf16.msra.mxu1 %v2887_v7  ;;  %806 = vmatprep.subr.bf16.mxu0 %v2888_v10  ;;  %v2894_v14 = vld [vmem:[#allocation7 + $0x44] ss:$16 sps:$4 sm:$0xff]   ;;  %v2896_v15 = vld [vmem:[#allocation7 + $0x4c] ss:$16 sps:$4 sm:$0xff]   ;;  %v2898_v16 = vld [vmem:[#allocation7 + $0x40] ss:$16 sps:$4 sm:$0xff]  }
  0xbe   : > { %522 = vadd.xlane.f32.xlu0 %v521_v3  ;;  %549 = vadd.xlane.f32.xlu1 %v3547_v2  ;;  %v2899_v17 = vld [vmem:[#allocation7 + $0x48] ss:$16 sps:$4 sm:$0xff]   ;;  %v2900_v18 = vld [vmem:[#allocation7 + $0x64] ss:$16 sps:$4 sm:$0xff]   ;;  %v2902_v19 = vld [vmem:[#allocation7 + $0x6c] ss:$16 sps:$4 sm:$0xff]  }
  0xbf   : > { %847 = vmatprep.subr.bf16.mxu1 %v2890_v11  ;;  %v2904_v20 = vld [vmem:[#allocation7 + $0x60] ss:$16 sps:$4 sm:$0xff]   ;;  %v2905_v21 = vld [vmem:[#allocation7 + $0x68] ss:$16 sps:$4 sm:$0xff]   ;;  %v2906_v22 = vld [vmem:[#allocation7 + $0x84] ss:$16 sps:$4 sm:$0xff]   ;;  %877 = vmatprep.mubr.bf16.mxu1 %v3221_v39 }
  0xc0   : > { %807 = vmatpush1.bf16.msra.mxu0 %v2892_v12  ;;  %v2908_v23 = vld [vmem:[#allocation7 + $0x8c] ss:$16 sps:$4 sm:$0xff]   ;;  %v2910_v24 = vld [vmem:[#allocation7 + $0x80] ss:$16 sps:$4 sm:$0xff]   ;;  %v2911_v25 = vld [vmem:[#allocation7 + $0x88] ss:$16 sps:$4 sm:$0xff]  }
  0xc1   : > { %848 = vmatpush1.bf16.msra.mxu1 %v2893_v13  ;;  %808 = vmatprep.subr.bf16.mxu0 %v2894_v14  ;;  %v2912_v26 = vld [vmem:[#allocation7 + $0xa4] ss:$16 sps:$4 sm:$0xff]   ;;  %v2914_v27 = vld [vmem:[#allocation7 + $0xac] ss:$16 sps:$4 sm:$0xff]   ;;  %v2916_v28 = vld [vmem:[#allocation7 + $0xa0] ss:$16 sps:$4 sm:$0xff]  }
  0xc2   : > { %557 = vadd.xlane.f32.xlu1 %v554_v8  ;;  %555 = vadd.xlane.f32.xlu0 %v553_v9  ;;  %v2917_v29 = vld [vmem:[#allocation7 + $0xa8] ss:$16 sps:$4 sm:$0xff]   ;;  %v2918_v30 = vld [vmem:[#allocation7 + $0xc4] ss:$16 sps:$4 sm:$0xff]   ;;  %v2920_v31 = vld [vmem:[#allocation7 + $0xcc] ss:$16 sps:$4 sm:$0xff]  }
  0xc3   : > { %849 = vmatprep.subr.bf16.mxu1 %v2896_v15  ;;  %v2922_v32 = vld [vmem:[#allocation7 + $0xc0] ss:$16 sps:$4 sm:$0xff]   ;;  %v2923_v33 = vld [vmem:[#allocation7 + $0xc8] ss:$16 sps:$4 sm:$0xff]   ;;  %v2924_v34 = vld [vmem:[#allocation7 + $0xe4] ss:$16 sps:$4 sm:$0xff]  }
  0xc4   : > { %809 = vmatpush1.bf16.msra.mxu0 %v2898_v16  ;;  %v2926_v35 = vld [vmem:[#allocation7 + $0xec] ss:$16 sps:$4 sm:$0xff]   ;;  %v3558_v36 = vld [vmem:[#allocation8] sm:$0xff]  ;;  %v2929_v43 = vld [vmem:[#allocation7 + $0xe8] ss:$16 sps:$4 sm:$0xff]   ;;  %vm1661_vm1 = vcmask 130048  }
  0xc5   : > { %850 = vmatpush1.bf16.msra.mxu1 %v2899_v17  ;;  %810 = vmatprep.subr.bf16.mxu0 %v2900_v18  ;;  %v891_v37 = vld [vmem:[#allocation8 + $0x20] sm:$0xff]  ;;  %v888_v41 = vld [vmem:[#allocation8 + $0x8] sm:$0xff]  ;;  %v2467_v62 = vld [vmem:[%s3774_s2] ss:$0 sm:$0xff]  ;;  %s3817_s27 = sld [smem:[#allocation23_spill]]  ;;  %s2605_s15 = sshll.u32 %s3311_s25, 7 }
  0xc6   : > { %851 = vmatprep.subr.bf16.mxu1 %v2902_v19  ;;  %v2928_v38 = vld [vmem:[#allocation7 + $0xe0] ss:$16 sps:$4 sm:$0xff]   ;;  %v2503_v40 = vcombine.low %v3558_v36, %v891_v37  ;;  %v892_v42 = vld [vmem:[#allocation8 + $0x28] sm:$0xff]  ;;  %v2504_v45 = vcombine.high %v3558_v36, %v891_v37  ;;  %s511_s7 = scalar_lea.vmem [#allocation11], %s2461_s13  ;;  %s3818_s16 = sld [smem:[#allocation24_spill]] }
  0xc7   : > { %v2505_v44 = vcombine.low %v888_v41, %v892_v42  ;;  %v2506_v46 = vcombine.high %v888_v41, %v892_v42  ;;  %v2468_v7 = vld [vmem:[%s3775_s3] ss:$0 sm:$0xff]  ;;  %v895_v8 = vld [vmem:[#allocation8 + $0x40] sm:$0xff]  ;;  %v896_v10 = vld [vmem:[#allocation8 + $0x48] sm:$0xff]  ;;  %s2328_s21 = sshll.u32 %s511_s7, 4  ;;  %s2315_s25 = scalar_lea.sflag [#allocation4], %s3519_s14  ;;  %s3730_s21 = int_to_ptr.vmem [resolvable:$true] %s2328_s21 }
  0xc8   : > { %811 = vmatpush1.bf16.msra.mxu0 %v2904_v20  ;;  %v899_v9 = vld [vmem:[#allocation8 + $0x60] sm:$0xff]  ;;  %v900_v11 = vld [vmem:[#allocation8 + $0x68] sm:$0xff]  ;;  %s3128_s28 = scalar_lea.vmem %s3730_s21, 128  ;;  %s3224_s13 = smov [#allocation11]  }
  0xc9   : > { %852 = vmatpush1.bf16.msra.mxu1 %v2905_v21  ;;  %812 = vmatprep.subr.bf16.mxu0 %v2906_v22  ;;  %v2512_v16 = vcombine.high %v895_v8, %v899_v9  ;;  %v2514_v17 = vcombine.high %v896_v10, %v900_v11  ;;  %v903_v18 = vld [vmem:[#allocation8 + $0x80] sm:$0xff]  ;;  %v904_v20 = vld [vmem:[#allocation8 + $0x88] sm:$0xff]  ;;  %p3129_p1 = scmp.ne.s32.totalorder %s3730_s21, %s3128_s28  ;;  %s3132_s11 = sshll.u32 %s3224_s13, 4  ;;  %s3133_s11 = int_to_ptr.vmem [resolvable:$false] %s3132_s11 }
  0xca   : > { %853 = vmatprep.subr.bf16.mxu1 %v2908_v23  ;;  %v907_v19 = vld [vmem:[#allocation8 + $0xa0] sm:$0xff]  ;;  %v908_v21 = vld [vmem:[#allocation8 + $0xa8] sm:$0xff]  ;;  %s3134_s30 = scalar_lea.vmem %s3133_s11, 256  ;;  %p3135_p8 = scmp.lt.s32.totalorder %s3730_s21, %s3133_s11 }
  0xcb   : > { %v919_v36 = vld [vmem:[#allocation8 + $0x100] sm:$0xff]  ;;  %p3130_p4 = pnand %p3129_p1, %p3432_p5  ;;  %p3136_p6 = scmp.lt.s32.totalorder %s3134_s30, %s3128_s28 }
  0xcc   : > { %813 = vmatpush1.bf16.msra.mxu0 %v2910_v24  ;;  %v2511_v24 = vcombine.low %v895_v8, %v899_v9  ;;  %v923_v37 = vld [vmem:[#allocation8 + $0x120] sm:$0xff]  ;;  %s3728_s8 = scalar_lea.hbm %s3818_s16, %s2605_s15 }
  0xcd   : > { %854 = vmatpush1.bf16.msra.mxu1 %v2911_v25  ;;  %814 = vmatprep.subr.bf16.mxu0 %v2912_v26  ;;  %v2513_v25 = vcombine.low %v896_v10, %v900_v11  ;;  %v2520_v26 = vcombine.high %v903_v18, %v907_v19  ;;  %p3131_p0 = pneg %p3130_p4  ;;  %p3137_p10 = por %p3136_p6, %p3135_p8 }
  0xce   : > { %855 = vmatprep.subr.bf16.mxu1 %v2914_v27  ;;  %v2522_v27 = vcombine.high %v904_v20, %v908_v21 }
  0xcf   : > { %p3138_p3 = pnand %p3137_p10, %p3131_p0 }
  0xd0   : > { %815 = vmatpush1.bf16.msra.mxu0 %v2916_v28  ;;  %v911_v28 = vld [vmem:[#allocation8 + $0xc0] sm:$0xff] }
  0xd1   : > { %856 = vmatpush1.bf16.msra.mxu1 %v2917_v29  ;;  %816 = vmatprep.subr.bf16.mxu0 %v2918_v30  ;;  %v915_v29 = vld [vmem:[#allocation8 + $0xe0] sm:$0xff]  ;;  %v912_v30 = vld [vmem:[#allocation8 + $0xc8] sm:$0xff] }
  0xd2   : > { %857 = vmatprep.subr.bf16.mxu1 %v2920_v31  ;;  %v916_v31 = vld [vmem:[#allocation8 + $0xe8] sm:$0xff]  ;;  %v2527_v41 = vcombine.low %v911_v28, %v915_v29 }
  0xd3   : > { %v2529_v42 = vcombine.low %v912_v30, %v916_v31 }
  0xd4   : > { %817 = vmatpush1.bf16.msra.mxu0 %v2922_v32  ;;  %v2519_v32 = vcombine.low %v903_v18, %v907_v19  ;;  %v894_v18 = vld [vmem:[#allocation8 + $0x38] sm:$0xff] }
  0xd5   : > { %858 = vmatpush1.bf16.msra.mxu1 %v2923_v33  ;;  %818 = vmatprep.subr.bf16.mxu0 %v2924_v34  ;;  %v2521_v33 = vcombine.low %v904_v20, %v908_v21  ;;  %v2528_v34 = vcombine.high %v911_v28, %v915_v29  ;;  %v902_v28 = vld [vmem:[#allocation8 + $0x78] sm:$0xff] }
  0xd6   : > { %859 = vmatprep.subr.bf16.mxu1 %v2926_v35  ;;  %v2530_v35 = vcombine.high %v912_v30, %v916_v31 }
  0xd8   : > { %819 = vmatpush1.bf16.msra.mxu0 %v2928_v38  ;;  %v920_v38 = vld [vmem:[#allocation8 + $0x108] sm:$0xff] }
  0xd9   : > { %860 = vmatpush1.bf16.msra.mxu1 %v2929_v43  ;;  %1313 = vmatprep.subr.bf16.mxu0 %v2504_v45  ;;  %v2536_v43 = vcombine.high %v919_v36, %v923_v37  ;;  %v927_v45 = vld [vmem:[#allocation8 + $0x140] sm:$0xff] }
  0xda   : > { %1356 = vmatprep.subr.bf16.mxu1 %v2506_v46  ;;  %v931_v46 = vld [vmem:[#allocation8 + $0x160] sm:$0xff] }
 0x147   : > { %v519_v47 = vpop.xlane.xlu0 %518  ;;  %v548_v53 = vpop.xlane.xlu1 %547 }
 0x148   : > { %v520_v48 = vmul.f32 0.03125, %v519_v47  ;;  %v3566_v57 = vmul.f32 0.041666668, %v548_v53  ;;  %v928_v47 = vld [vmem:[#allocation8 + $0x148] sm:$0xff] }
 0x14a   : > { %v525_v50 = vmul.f32 %v520_v48, %v520_v48  ;;  %v527_v59 = vsub.f32 %v3543_v0, %v520_v48  ;;  %v561_v5 = vmul.f32 %v3566_v57, %v3566_v57  ;;  %v932_v48 = vld [vmem:[#allocation8 + $0x168] sm:$0xff]  ;;  %v565_v53 = vsub.f32 %v3545_v1, %v3566_v57  ;;  %v943_v1 = vld [vmem:[#allocation8 + $0x1c0] sm:$0xff] }
 0x14b   : > { %v523_v49 = vpop.xlane.xlu0 %522  ;;  %v550_v55 = vpop.xlane.xlu1 %549  ;;  %v947_v57 = vld [vmem:[#allocation8 + $0x1e0] sm:$0xff] }
 0x14c   : > { %v524_v51 = vmul.f32 0.03125, %v523_v49  ;;  %v3564_v56 = vmul.f32 0.041666668, %v550_v55  ;;  %v2535_v49 = vcombine.low %v919_v36, %v923_v37  ;;  %v2546_v55 = vcombine.high %v928_v47, %v932_v48  ;;  %v906_v36 = vld [vmem:[#allocation8 + $0x98] sm:$0xff] }
 0x14d   : > { %v2560_v10 = vcombine.high %v943_v1, %v947_v57  ;;  %v2559_v19 = vcombine.low %v943_v1, %v947_v57  ;;  %v910_v37 = vld [vmem:[#allocation8 + $0xb8] sm:$0xff]  ;;  %v937_v57 = vld [vmem:[#allocation8 + $0x190] sm:$0xff] }
 0x14e   : > { %v526_v52 = vsub.f32 %v524_v51, %v525_v50  ;;  %v562_v63 = vmul.f32 %v3564_v56, %v3564_v56  ;;  %v2544_v51 = vcombine.high %v927_v45, %v931_v46 }
 0x14f   : > { %v558_v58 = vpop.xlane.xlu1 %557  ;;  %v556_v60 = vpop.xlane.xlu0 %555 }
 0x150   : > { %v528_v54 = vadd.f32 1e-05, %v526_v52  ;;  %v560_v3 = vmul.f32 0.041666668, %v558_v58  ;;  %v559_v6 = vmul.f32 0.041666668, %v556_v60 }
 0x151   : > { %v935_v58 = vld [vmem:[#allocation8 + $0x180] sm:$0xff] }
 0x152   : > { %2962 = vrsqrt.f32 %v528_v54  ;;  %v564_v12 = vsub.f32 %v560_v3, %v562_v63  ;;  %v563_v14 = vsub.f32 %v559_v6, %v561_v5  ;;  %v566_v54 = vsub.f32 %v3547_v2, %v3564_v56  ;;  %v944_v56 = vld [vmem:[#allocation8 + $0x1c8] sm:$0xff] }
 0x153   : > { %v2543_v63 = vcombine.low %v927_v45, %v931_v46  ;;  %v2545_v3 = vcombine.low %v928_v47, %v932_v48  ;;  %v914_v45 = vld [vmem:[#allocation8 + $0xd8] sm:$0xff]  ;;  %v2525_v48 = vcombine.low %v906_v36, %v910_v37 }
 0x154   : > { %v568_v22 = vadd.f32 1e-05, %v564_v12  ;;  %v567_v23 = vadd.f32 1e-05, %v563_v14  ;;  %v889_v14 = vld [vmem:[#allocation8 + $0x10] sm:$0xff]  ;;  %v918_v46 = vld [vmem:[#allocation8 + $0xf8] sm:$0xff] }
 0x156   : > { %2964 = vrsqrt.f32 %v568_v22 }
 0x157   : > { %2966 = vrsqrt.f32 %v567_v23 }
 0x15c   : > { %v2963_v61 = vpop.eup %2962 }
 0x15d   : > { %v530_v4 = vmul.f32 %v2963_v61, %v527_v59  ;;  %v939_v59 = vld [vmem:[#allocation8 + $0x1a0] sm:$0xff]  ;;  %v936_v61 = vld [vmem:[#allocation8 + $0x188] sm:$0xff] }
 0x15e   : > { %v2551_v8 = vcombine.low %v935_v58, %v939_v59 }
 0x15f   : > { %v537_v0 = vmul.f32 %v2467_v62, %v530_v4  ;;  %v940_v62 = vld [vmem:[#allocation8 + $0x1a8] sm:$0xff]  ;;  %v2552_v4 = vcombine.high %v935_v58, %v939_v59  ;;  %v2533_v58 = vcombine.low %v914_v45, %v918_v46 }
 0x160   : > { %v2965_v52 = vpop.eup %2964  ;;  %v2554_v5 = vcombine.high %v936_v61, %v940_v62  ;;  %v2553_v9 = vcombine.low %v936_v61, %v940_v62  ;;  %v933_v61 = vld [vmem:[#allocation8 + $0x170] sm:$0xff]  ;;  %v930_v62 = vld [vmem:[#allocation8 + $0x158] sm:$0xff] }
 0x161   : > { %v544_v13 = vadd.f32 %v2468_v7, %v537_v0  ;;  %v2967_v60 = vpop.eup %2966  ;;  %v572_v2 = vmul.f32 %v2965_v52, %v566_v54  ;;  %v948_v7 = vld [vmem:[#allocation8 + $0x1e8] sm:$0xff]  ;;  %v2469_v0 = vld [vmem:[%s3776_s4] ss:$0 sm:$0xff]  ;;  %v926_v54 = vld [vmem:[#allocation8 + $0x138] sm:$0xff] }
 0x162   : > { %v571_v6 = vmul.f32 %v2967_v60, %v565_v53  ;;  %v2562_v11 = vcombine.high %v944_v56, %v948_v7  ;;  %v2561_v20 = vcombine.low %v944_v56, %v948_v7  ;;  %v925_v52 = vld [vmem:[#allocation8 + $0x130] sm:$0xff]  ;;  %v922_v53 = vld [vmem:[#allocation8 + $0x118] sm:$0xff] }
 0x163   : > { %v589_v15 = vpack.c.bf16 %v544_v13, %v544_v13  ;;  %v580_v13 = vmul.f32 %v2469_v0, %v572_v2  ;;  %v929_v60 = vld [vmem:[#allocation8 + $0x150] sm:$0xff]  ;;  %v938_v2 = vld [vmem:[#allocation8 + $0x198] sm:$0xff] }
 0x164   : > { %v579_v12 = vmul.f32 %v2469_v0, %v571_v6  ;;  %v941_v6 = vld [vmem:[#allocation8 + $0x1b0] sm:$0xff]  ;;  %v942_v56 = vld [vmem:[#allocation8 + $0x1b8] sm:$0xff]  ;;  %v2547_v7 = vcombine.low %v929_v60, %v933_v61 }
 0x165   : > { %837 = vmatmul.mubr.bf16.vlgmr.msra.gmra.mrb[0].mxu0 %v589_v15  ;;  %878 = vmatmul.mubr.bf16.vlgmr.msra.gmra.mrb[0].mxu1 %v589_v15  ;;  %v893_v15 = vld [vmem:[#allocation8 + $0x30] sm:$0xff] }
 0x166   : > { %1314 = vmatpush1.bf16.msra.mxu0 %v2503_v40  ;;  %1357 = vmatpush1.bf16.msra.mxu1 %v2505_v44  ;;  %v924_v40 = vld [vmem:[#allocation8 + $0x128] sm:$0xff]  ;;  %v2508_v21 = vcombine.high %v889_v14, %v893_v15  ;;  %v2507_v29 = vcombine.low %v889_v14, %v893_v15  ;;  %v2555_v14 = vcombine.low %v937_v57, %v941_v6 }
 0x167   : > { %1315 = vmatprep.subr.bf16.mxu0 %v2512_v16  ;;  %1358 = vmatprep.subr.bf16.mxu1 %v2514_v17  ;;  %v2538_v44 = vcombine.high %v920_v38, %v924_v40  ;;  %v2537_v50 = vcombine.low %v920_v38, %v924_v40  ;;  %v2470_v16 = vld [vmem:[%s3777_s5] ss:$0 sm:$0xff]  ;;  %v890_v17 = vld [vmem:[#allocation8 + $0x18] sm:$0xff]  ;;  %v2557_v15 = vcombine.low %v938_v2, %v942_v56 }
 0x168   : > { %1345 = vmatprep.mubr.bf16.mxu0 %v3221_v39  ;;  %1388 = vmatprep.mubr.bf16.mxu1 %v3221_v39  ;;  %v587_v22 = vadd.f32 %v2470_v16, %v579_v12  ;;  %v588_v23 = vadd.f32 %v2470_v16, %v580_v13  ;;  %v2509_v30 = vcombine.low %v890_v17, %v894_v18  ;;  %v946_v12 = vld [vmem:[#allocation8 + $0x1d8] sm:$0xff] }
 0x169   : > { %v950_v13 = vld [vmem:[#allocation8 + $0x1f8] sm:$0xff] }
 0x16a   : > { %1316 = vmatpush1.bf16.msra.mxu0 %v2511_v24  ;;  %1359 = vmatpush1.bf16.msra.mxu1 %v2513_v25  ;;  %v2510_v24 = vcombine.high %v890_v17, %v894_v18  ;;  %v897_v25 = vld [vmem:[#allocation8 + $0x50] sm:$0xff]  ;;  %v3591_v31 = vpack.c.bf16 %v588_v23, %v587_v22  ;;  %v2566_v17 = vcombine.high %v946_v12, %v950_v13 }
 0x16b   : > { %1317 = vmatprep.subr.bf16.mxu0 %v2520_v26  ;;  %1360 = vmatprep.subr.bf16.mxu1 %v2522_v27  ;;  %v901_v26 = vld [vmem:[#allocation8 + $0x70] sm:$0xff]  ;;  %v898_v27 = vld [vmem:[#allocation8 + $0x58] sm:$0xff] }
 0x16c   : > { %v2515_v38 = vcombine.low %v897_v25, %v901_v26  ;;  %v2517_v40 = vcombine.low %v898_v27, %v902_v28 }
 0x16e   : > { %1318 = vmatpush1.bf16.msra.mxu0 %v2519_v32  ;;  %1361 = vmatpush1.bf16.msra.mxu1 %v2521_v33  ;;  %v2516_v32 = vcombine.high %v897_v25, %v901_v26  ;;  %v2518_v33 = vcombine.high %v898_v27, %v902_v28 }
 0x16f   : > { %1319 = vmatprep.subr.bf16.mxu0 %v2528_v34  ;;  %1362 = vmatprep.subr.bf16.mxu1 %v2530_v35  ;;  %v905_v34 = vld [vmem:[#allocation8 + $0x90] sm:$0xff] }
 0x170   : > { %v909_v35 = vld [vmem:[#allocation8 + $0xb0] sm:$0xff] }
 0x171   : > { %v2523_v47 = vcombine.low %v905_v34, %v909_v35 }
 0x172   : > { %1320 = vmatpush1.bf16.msra.mxu0 %v2527_v41  ;;  %1363 = vmatpush1.bf16.msra.mxu1 %v2529_v42  ;;  %v2524_v41 = vcombine.high %v905_v34, %v909_v35  ;;  %v2526_v42 = vcombine.high %v906_v36, %v910_v37  ;;  %v622_v36 = vld [vmem:[%s3816_s29] sm:$0xf] }
 0x173   : > { %1321 = vmatprep.subr.bf16.mxu0 %v2536_v43  ;;  %1364 = vmatprep.subr.bf16.mxu1 %v2538_v44  ;;  %v913_v43 = vld [vmem:[#allocation8 + $0xd0] sm:$0xff] }
 0x174   : > { %v917_v44 = vld [vmem:[#allocation8 + $0xf0] sm:$0xff] }
 0x176   : > { %1322 = vmatpush1.bf16.msra.mxu0 %v2535_v49  ;;  %1365 = vmatpush1.bf16.msra.mxu1 %v2537_v50  ;;  %v2532_v49 = vcombine.high %v913_v43, %v917_v44  ;;  %v2534_v50 = vcombine.high %v914_v45, %v918_v46 }
 0x177   : > { %1323 = vmatprep.subr.bf16.mxu0 %v2544_v51  ;;  %1366 = vmatprep.subr.bf16.mxu1 %v2546_v55  ;;  %v921_v51 = vld [vmem:[#allocation8 + $0x110] sm:$0xff]  ;;  %v2531_v55 = vcombine.low %v913_v43, %v917_v44 }
 0x178   : > { %v2540_v59 = vcombine.high %v921_v51, %v925_v52 }
 0x17a   : > { %1324 = vmatpush1.bf16.msra.mxu0 %v2543_v63  ;;  %1367 = vmatpush1.bf16.msra.mxu1 %v2545_v3  ;;  %v934_v63 = vld [vmem:[#allocation8 + $0x178] sm:$0xff]  ;;  %v2539_v3 = vcombine.low %v921_v51, %v925_v52 }
 0x17b   : > { %1325 = vmatprep.subr.bf16.mxu0 %v2552_v4  ;;  %1368 = vmatprep.subr.bf16.mxu1 %v2554_v5  ;;  %v2541_v4 = vcombine.low %v922_v53, %v926_v54  ;;  %v2548_v5 = vcombine.high %v929_v60, %v933_v61  ;;  %v2550_v1 = vcombine.high %v930_v62, %v934_v63 }
 0x17c   : > { %v2549_v0 = vcombine.low %v930_v62, %v934_v63 }
 0x17e   : > { %1326 = vmatpush1.bf16.msra.mxu0 %v2551_v8  ;;  %1369 = vmatpush1.bf16.msra.mxu1 %v2553_v9  ;;  %v2556_v8 = vcombine.high %v937_v57, %v941_v6  ;;  %v2558_v9 = vcombine.high %v938_v2, %v942_v56 }
 0x17f   : > { %1327 = vmatprep.subr.bf16.mxu0 %v2560_v10  ;;  %1370 = vmatprep.subr.bf16.mxu1 %v2562_v11  ;;  %v945_v10 = vld [vmem:[#allocation8 + $0x1d0] sm:$0xff] }
 0x180   : > { %v949_v11 = vld [vmem:[#allocation8 + $0x1f0] sm:$0xff] }
 0x181   : > { %v2564_v16 = vcombine.high %v945_v10, %v949_v11  ;;  %v2563_v18 = vcombine.low %v945_v10, %v949_v11 }
 0x182   : > { %1328 = vmatpush1.bf16.msra.mxu0 %v2559_v19  ;;  %1371 = vmatpush1.bf16.msra.mxu1 %v2561_v20  ;;  %v2565_v19 = vcombine.low %v946_v12, %v950_v13  ;;  %v3222_v20 = vmov 0.0  }
 0x183   : > { %1399 = vmatprep.subr.bf16.mxu0 %v2508_v21  ;;  %1442 = vmatprep.subr.bf16.mxu1 %v2510_v24 }
 0x185   : > { %1346 = vmatmul.mubr.bf16.vlgmr.msra.gmra.mrb[4].mxu0 %v3591_v31  ;;  %1389 = vmatmul.mubr.bf16.vlgmr.msra.gmra.mrb[4].mxu1 %v3591_v31 }
 0x186   : > { %1400 = vmatpush1.bf16.msra.mxu0 %v2507_v29  ;;  %1443 = vmatpush1.bf16.msra.mxu1 %v2509_v30  ;;  %v624_v29 = vlaneseq }
 0x187   : > { %1401 = vmatprep.subr.bf16.mxu0 %v2516_v32  ;;  %1444 = vmatprep.subr.bf16.mxu1 %v2518_v33 }
 0x188   : > { %1431 = vmatprep.mubr.bf16.mxu0 %v3221_v39  ;;  %1474 = vmatprep.mubr.bf16.mxu1 %v3221_v39  ;;  %v2542_v39 = vcombine.high %v922_v53, %v926_v54  ;;  %v3605_v30 = vshrl.u32 %v624_v29, 7 }
 0x18a   : > { %1402 = vmatpush1.bf16.msra.mxu0 %v2515_v38  ;;  %1445 = vmatpush1.bf16.msra.mxu1 %v2517_v40  ;;  %v626_v32 = vsub.s32 0, %v3605_v30  ;;  %v634_v33 = vsub.s32 2, %v3605_v30  ;;  %v630_v34 = vsub.s32 1, %v3605_v30  ;;  %v638_v35 = vsub.s32 3, %v3605_v30 }
 0x18b   : > { %1403 = vmatprep.subr.bf16.mxu0 %v2524_v41  ;;  %1446 = vmatprep.subr.bf16.mxu1 %v2526_v42  ;;  %v983_v10 = vsub.s32 7, %v3605_v30  ;;  %v971_v11 = vsub.s32 4, %v3605_v30  ;;  %v975_v12 = vsub.s32 5, %v3605_v30 }
 0x18c   : > { %v627_v46 = vrot.slane %v622_v36, %v626_v32  ;;  %v631_v60 = vrot.slane %v622_v36, %v630_v34  ;;  %v635_v57 = vrot.slane %v622_v36, %v634_v33  ;;  %v639_v2 = vrot.slane %v622_v36, %v638_v35 }
 0x18e   : > { %1404 = vmatpush1.bf16.msra.mxu0 %v2523_v47  ;;  %1447 = vmatpush1.bf16.msra.mxu1 %v2525_v48 }
 0x18f   : > { %1405 = vmatprep.subr.bf16.mxu0 %v2532_v49  ;;  %1448 = vmatprep.subr.bf16.mxu1 %v2534_v50 }
 0x192   : > { %1406 = vmatpush1.bf16.msra.mxu0 %v2531_v55  ;;  %1449 = vmatpush1.bf16.msra.mxu1 %v2533_v58 }
 0x193   : > { %1407 = vmatprep.subr.bf16.mxu0 %v2540_v59  ;;  %1450 = vmatprep.subr.bf16.mxu1 %v2542_v39 }
 0x196   : > { %1408 = vmatpush1.bf16.msra.mxu0 %v2539_v3  ;;  %1451 = vmatpush1.bf16.msra.mxu1 %v2541_v4 }
 0x197   : > { %1409 = vmatprep.subr.bf16.mxu0 %v2548_v5  ;;  %1452 = vmatprep.subr.bf16.mxu1 %v2550_v1 }
 0x19a   : > { %1410 = vmatpush1.bf16.msra.mxu0 %v2547_v7  ;;  %1453 = vmatpush1.bf16.msra.mxu1 %v2549_v0 }
 0x19b   : > { %1411 = vmatprep.subr.bf16.mxu0 %v2556_v8  ;;  %1454 = vmatprep.subr.bf16.mxu1 %v2558_v9  ;;  %v979_v9 = vsub.s32 6, %v3605_v30 }
 0x19e   : > { %1412 = vmatpush1.bf16.msra.mxu0 %v2555_v14  ;;  %1455 = vmatpush1.bf16.msra.mxu1 %v2557_v15 }
 0x19f   : > { %1413 = vmatprep.subr.bf16.mxu0 %v2564_v16  ;;  %1456 = vmatprep.subr.bf16.mxu1 %v2566_v17 }
 0x1a2   : > { %1414 = vmatpush1.bf16.msra.mxu0 %v2563_v18  ;;  %1457 = vmatpush1.bf16.msra.mxu1 %v2565_v19 }
 0x1a3   : > { %2661 = vmatprep.subr.bf16.mxu0 %v3222_v20  ;;  %2667 = vmatprep.subr.bf16.mxu1 %v3222_v20 }
 0x1a5   : > { %1432 = vmatmul.mubr.bf16.vlgmr.msra.gmra.mrb[8].mxu0 %v3591_v31  ;;  %1475 = vmatmul.mubr.bf16.vlgmr.msra.gmra.mrb[8].mxu1 %v3591_v31  ;;  %v3610_v31 = vld [vmem:[%s3781_s9] sm:$0xff] }
 0x1a6   : > { %2663 = vmatprep.mubr.msk.bf16.mxu0 %vm3223_vm0, %v3222_v20  ;;  %2669 = vmatprep.mubr.msk.bf16.mxu1 %vm3223_vm0, %v3222_v20  ;;  %v956_v37 = vrot.slane %v3610_v31, %v626_v32  ;;  %v964_v38 = vrot.slane %v3610_v31, %v634_v33  ;;  %v960_v42 = vrot.slane %v3610_v31, %v630_v34 }
 0x1a7   : > { %v968_v43 = vrot.slane %v3610_v31, %v638_v35  ;;  %v980_v13 = vrot.slane %v3610_v31, %v979_v9  ;;  %v984_v14 = vrot.slane %v3610_v31, %v983_v10  ;;  %v972_v15 = vrot.slane %v3610_v31, %v971_v11 }
 0x1a8   : > { %v976_v18 = vrot.slane %v3610_v31, %v975_v12 }
 0x238   : > { %v838_v21 = vpop.f32.mrb[0].mxu0  ;;  %v879_v22 = vpop.f32.mrb[0].mxu1 }
 0x239   : > { %v840_v23 = vpop.f32.mrb[1].mxu0  ;;  %v881_v24 = vpop.f32.mrb[1].mxu1  ;;  %v839_v4 = vadd.f32 %v838_v21, %v627_v46  ;;  %v880_v56 = vadd.f32 %v879_v22, %v635_v57 }
 0x23a   : > { %v842_v25 = vpop.f32.mrb[2].mxu0  ;;  %v883_v26 = vpop.f32.mrb[2].mxu1  ;;  %v841_v5 = vadd.f32 %v840_v23, %v631_v60  ;;  %v882_v7 = vadd.f32 %v881_v24, %v639_v2 }
 0x23b   : > { %v843_v27 = vpop.f32.mrb[3].mxu0  ;;  %v884_v28 = vpop.f32.mrb[3].mxu1  ;;  %v1485_v1 = vpack.c.bf16 %v839_v4, %v839_v4  ;;  %v1487_v0 = vpack.c.bf16 %v880_v56, %v880_v56 }
 0x23c   : > { %v1486_v6 = vpack.c.bf16 %v841_v5, %v841_v5  ;;  %v1488_v8 = vpack.c.bf16 %v882_v7, %v882_v7 }
 0x258   : > { %v1347_v40 = vpop.f32.mrb[4].mxu0  ;;  %v1390_v41 = vpop.f32.mrb[4].mxu1 }
 0x259   : > { %v1349_v44 = vpop.f32.mrb[5].mxu0  ;;  %v1392_v45 = vpop.f32.mrb[5].mxu1  ;;  %v1348_v49 = vadd.f32 %v1347_v40, %v956_v37  ;;  %v1391_v50 = vadd.f32 %v1390_v41, %v964_v38 }
 0x25a   : > { %v1351_v47 = vpop.f32.mrb[6].mxu0  ;;  %v1394_v48 = vpop.f32.mrb[6].mxu1  ;;  %v1350_v55 = vadd.f32 %v1349_v44, %v960_v42  ;;  %v1393_v58 = vadd.f32 %v1392_v45, %v968_v43 }
 0x25b   : > { %v1352_v51 = vadd.f32 %v1351_v47, %v956_v37  ;;  %v1395_v52 = vadd.f32 %v1394_v48, %v964_v38  ;;  %v1353_v53 = vpop.f32.mrb[7].mxu0  ;;  %v1396_v54 = vpop.f32.mrb[7].mxu1 }
 0x25c   : > { %v1354_v59 = vadd.f32 %v1353_v53, %v960_v42  ;;  %v1397_v39 = vadd.f32 %v1396_v54, %v968_v43 }
 0x25d   : > { %v1489_v61 = vpack.c.bf16 %v1352_v51, %v1348_v49  ;;  %v1491_v62 = vpack.c.bf16 %v1395_v52, %v1391_v50 }
 0x25e   : > { %v1490_v63 = vpack.c.bf16 %v1354_v59, %v1350_v55  ;;  %v1492_v3 = vpack.c.bf16 %v1397_v39, %v1393_v58 }
 0x25f   : > { %2662 = vmatpush3.bf16.xpose.msra.mxu0 %v1489_v61 }
 0x260   : > { %2668 = vmatpush3.bf16.xpose.msra.mxu1 %v1490_v63  ;;  %2673 = vmatprep.subr.bf16.mxu0 %v3222_v20 }
 0x261   : > { %2679 = vmatprep.subr.bf16.mxu1 %v3222_v20 }
 0x266   : > { %2664 = vmatmul.mubr.bf16.vlgmr.msra.gmra.mrb[12].mxu0 %v1485_v1 }
 0x267   : > { %2670 = vmatmul.mubr.bf16.vlgmr.msra.gmra.mrb[12].mxu1 %v1486_v6  ;;  %2674 = vmatpush3.bf16.xpose.msra.mxu0 %v1491_v62 }
 0x268   : > { %2680 = vmatpush3.bf16.xpose.msra.mxu1 %v1492_v3  ;;  %2675 = vmatprep.mubr.msk.bf16.mxu0 %vm3223_vm0, %v3222_v20 }
 0x269   : > { %2681 = vmatprep.mubr.msk.bf16.mxu1 %vm3223_vm0, %v3222_v20  ;;  %2685 = vmatprep.subr.bf16.mxu0 %v3222_v20 }
 0x26a   : > { %2691 = vmatprep.subr.bf16.mxu1 %v3222_v20 }
 0x26e   : > { %2676 = vmatmul.mubr.bf16.vlgmr.msra.gmra.mrb[16].mxu0 %v1487_v0 }
 0x26f   : > { %2682 = vmatmul.mubr.bf16.vlgmr.msra.gmra.mrb[16].mxu1 %v1488_v8  ;;  %2687 = vmatprep.mubr.msk.bf16.mxu0 %vm3223_vm0, %v3222_v20 }
 0x270   : > { %2693 = vmatprep.mubr.msk.bf16.mxu1 %vm3223_vm0, %v3222_v20 }
 0x278   : > { %v1433_v16 = vpop.f32.mrb[8].mxu0  ;;  %v1476_v17 = vpop.f32.mrb[8].mxu1 }
 0x279   : > { %v3643_v19 = vadd.f32 %v1476_v17, %v980_v13  ;;  %v1435_v21 = vpop.f32.mrb[9].mxu0  ;;  %v1478_v22 = vpop.f32.mrb[9].mxu1  ;;  %v1434_v26 = vadd.f32 %v1433_v16, %v972_v15 }
 0x27a   : > { %v3645_v23 = vadd.f32 %v1478_v22, %v984_v14  ;;  %v1437_v24 = vpop.f32.mrb[10].mxu0  ;;  %v1480_v25 = vpop.f32.mrb[10].mxu1  ;;  %v1436_v32 = vadd.f32 %v1435_v21, %v976_v18 }
 0x27b   : > { %v1438_v27 = vadd.f32 %v1437_v24, %v972_v15  ;;  %v3647_v28 = vadd.f32 %v1480_v25, %v980_v13  ;;  %v1439_v29 = vpop.f32.mrb[11].mxu0  ;;  %v1482_v30 = vpop.f32.mrb[11].mxu1 }
 0x27c   : > { %v1440_v33 = vadd.f32 %v1439_v29, %v976_v18  ;;  %v3649_v34 = vadd.f32 %v1482_v30, %v984_v14 }
 0x27d   : > { %v1493_v35 = vpack.c.bf16 %v1438_v27, %v1434_v26  ;;  %v1495_v31 = vpack.c.bf16 %v3647_v28, %v3643_v19  ;;  %v2930_v28 = vld [vmem:[#allocation10] sm:$0xff]  }
 0x27e   : > { %v1494_v36 = vpack.c.bf16 %v1440_v33, %v1436_v32  ;;  %v1496_v37 = vpack.c.bf16 %v3649_v34, %v3645_v23  ;;  %v2932_v23 = vld [vmem:[#allocation10 + $0x8] sm:$0xff]  }
 0x27f   : > { %2686 = vmatpush3.bf16.msra.mxu0 %v1493_v35  ;;  %v2933_v34 = vld [vmem:[#allocation10 + $0x48] sm:$0xff]  }
 0x280   : > { %2692 = vmatpush3.bf16.msra.mxu1 %v1494_v36  ;;  %2697 = vmatprep.subr.bf16.mxu0 %v3222_v20 }
 0x281   : > { %2703 = vmatprep.subr.bf16.mxu1 %v3222_v20 }
 0x339   : > { %v1531_v38 = vpop.f32.mrb[12].mxu0 }
 0x33a   : > { %v1657_v40 = vmul.f32 0.35355338, %v1531_v38  ;;  %v2665_v41 = vpop.f32.mrb[13].mxu0  ;;  %v1571_v42 = vpop.f32.mrb[12].mxu1  ;;  %v2931_v38 = vld [vmem:[#allocation10 + $0x40] sm:$0xff]  }
 0x33b   : > { %v1658_v43 = vmul.f32 0.35355338, %v1571_v42  ;;  %v1534_v44 = vpop.f32.mrb[14].mxu0  ;;  %v2671_v45 = vpop.f32.mrb[13].mxu1  ;;  %v2935_v41 = vld [vmem:[#allocation10 + $0x50] sm:$0xff]   ;;  %v2936_v42 = vld [vmem:[#allocation10 + $0x18] sm:$0xff]  }
 0x33c   : > { %v2666_v46 = vpop.f32.mrb[15].mxu0  ;;  %v1574_v47 = vpop.f32.mrb[14].mxu1  ;;  %v1662_v48 = vsel %vm1661_vm1, %v1657_v40, -inf  ;;  %v2938_v44 = vld [vmem:[#allocation10 + $0x20] sm:$0xff]  }
 0x33d   : > { %v2672_v49 = vpop.f32.mrb[15].mxu1  ;;  %1663 = vmax.xlane.f32.xlu0 %v1662_v48  ;;  %v1665_v50 = vsel %vm1661_vm1, %v1658_v43, -inf  ;;  %v2939_v45 = vld [vmem:[#allocation10 + $0x60] sm:$0xff]   ;;  %v2940_v46 = vld [vmem:[#allocation10 + $0x28] sm:$0xff]   ;;  %v2942_v48 = vld [vmem:[#allocation10 + $0x30] sm:$0xff]  }
 0x33e   : > { %1666 = vmax.xlane.f32.xlu1 %v1665_v50  ;;  %v2941_v47 = vld [vmem:[#allocation10 + $0x68] sm:$0xff]   ;;  %v2943_v49 = vld [vmem:[#allocation10 + $0x70] sm:$0xff]   ;;  %v2944_v50 = vld [vmem:[#allocation10 + $0x38] sm:$0xff]  }
 0x341   : > { %v1611_v51 = vpop.f32.mrb[16].mxu0 }
 0x342   : > { %v1659_v52 = vmul.f32 0.35355338, %v1611_v51  ;;  %v2677_v53 = vpop.f32.mrb[17].mxu0  ;;  %v1651_v54 = vpop.f32.mrb[16].mxu1  ;;  %v2945_v51 = vld [vmem:[#allocation10 + $0x78] sm:$0xff]  }
 0x343   : > { %v1660_v55 = vmul.f32 0.35355338, %v1651_v54  ;;  %v1614_v58 = vpop.f32.mrb[18].mxu0  ;;  %v2683_v59 = vpop.f32.mrb[17].mxu1  ;;  %v2946_v53 = vld [vmem:[#allocation10 + $0x80] sm:$0xff]  }
 0x344   : > { %v2678_v39 = vpop.f32.mrb[19].mxu0  ;;  %v1654_v60 = vpop.f32.mrb[18].mxu1  ;;  %v1668_v61 = vsel %vm1661_vm1, %v1659_v52, -inf  ;;  %v2947_v59 = vld [vmem:[#allocation10 + $0xc0] sm:$0xff]  }
 0x345   : > { %v2684_v62 = vpop.f32.mrb[19].mxu1  ;;  %1669 = vmax.xlane.f32.xlu0 %v1668_v61  ;;  %v1671_v63 = vsel %vm1661_vm1, %v1660_v55, -inf }
 0x346   : > { %1672 = vmax.xlane.f32.xlu1 %v1671_v63 }
 0x3ca   : > { %v1664_v3 = vpop.xlane.xlu0 %1663 }
 0x3cb   : > { %v1674_v4 = vsub.f32 %v1657_v40, %v1664_v3  ;;  %v1667_v5 = vpop.xlane.xlu1 %1666 }
 0x3cc   : > { %v1675_v1 = vsub.f32 %v1658_v43, %v1667_v5  ;;  %v2937_v43 = vld [vmem:[#allocation10 + $0x58] sm:$0xff]   ;;  %v2949_v5 = vld [vmem:[#allocation10 + $0xc8] sm:$0xff]  }
 0x3cd   : > { %v1678_v57 = vmul.f32 1.442695, %v1674_v4  ;;  %v2948_v4 = vld [vmem:[#allocation10 + $0x88] sm:$0xff]  }
 0x3ce   : > { %v1680_v6 = vmul.f32 1.442695, %v1675_v1 }
 0x3cf   : > { %2968 = vpow2.f32 %v1678_v57  ;;  %v2950_v57 = vld [vmem:[#allocation10 + $0x90] sm:$0xff]  }
 0x3d0   : > { %2970 = vpow2.f32 %v1680_v6 }
 0x3d2   : > { %v1670_v2 = vpop.xlane.xlu0 %1669 }
 0x3d3   : > { %v1676_v56 = vsub.f32 %v1659_v52, %v1670_v2  ;;  %v1673_v7 = vpop.xlane.xlu1 %1672 }
 0x3d4   : > { %v1677_v0 = vsub.f32 %v1660_v55, %v1673_v7 }
 0x3d5   : > { %v1682_v8 = vmul.f32 1.442695, %v1676_v56  ;;  %v2951_v56 = vld [vmem:[#allocation10 + $0xd0] sm:$0xff]  }
 0x3d6   : > { %v1684_v9 = vmul.f32 1.442695, %v1677_v0 }
 0x3d7   : > { %2972 = vpow2.f32 %v1682_v8 }
 0x3d8   : > { %2974 = vpow2.f32 %v1684_v9 }
 0x3d9   : > { %v2969_v10 = vpop.eup %2968 }
 0x3da   : > { %v2971_v11 = vpop.eup %2970  ;;  %v1686_v12 = vsel %vm1661_vm1, %v2969_v10, 0.0 }
 0x3db   : > { %1687 = vadd.xlane.f32.xlu0 %v1686_v12  ;;  %v1689_v13 = vsel %vm1661_vm1, %v2971_v11, 0.0  ;;  %v2953_v12 = vld [vmem:[#allocation10 + $0xd8] sm:$0xff]  }
 0x3dc   : > { %1690 = vadd.xlane.f32.xlu1 %v1689_v13  ;;  %v2954_v13 = vld [vmem:[#allocation10 + $0xa0] sm:$0xff]  }
 0x3e1   : > { %v2973_v14 = vpop.eup %2972 }
 0x3e2   : > { %v2975_v15 = vpop.eup %2974  ;;  %v1692_v16 = vsel %vm1661_vm1, %v2973_v14, 0.0 }
 0x3e3   : > { %1693 = vadd.xlane.f32.xlu0 %v1692_v16  ;;  %v1695_v17 = vsel %vm1661_vm1, %v2975_v15, 0.0  ;;  %v2957_v16 = vld [vmem:[#allocation10 + $0xe8] sm:$0xff]  }
 0x3e4   : > { %1696 = vadd.xlane.f32.xlu1 %v1695_v17  ;;  %v2958_v17 = vld [vmem:[#allocation10 + $0xb0] sm:$0xff]  }
 0x468   : > { %v1688_v18 = vpop.xlane.xlu0 %1687 }
 0x469   : > { %2976 = vrcp.f32 %v1688_v18  ;;  %v1691_v21 = vpop.xlane.xlu1 %1690  ;;  %v2959_v18 = vld [vmem:[#allocation10 + $0xf0] sm:$0xff]  }
 0x46a   : > { %2978 = vrcp.f32 %v1691_v21  ;;  %v2960_v21 = vld [vmem:[#allocation10 + $0xb8] sm:$0xff]  }
 0x470   : > { %v1694_v22 = vpop.xlane.xlu0 %1693 }
 0x471   : > { %2980 = vrcp.f32 %v1694_v22  ;;  %v1697_v24 = vpop.xlane.xlu1 %1696  ;;  %v2961_v22 = vld [vmem:[#allocation10 + $0xf8] sm:$0xff]  }
 0x472   : > { %2982 = vrcp.f32 %v1697_v24 }
 0x473   : > { %v2977_v25 = vpop.eup %2976 }
 0x474   : > { %v2979_v26 = vpop.eup %2978  ;;  %v1702_v27 = vmul.f32 %v2977_v25, %v2969_v10 }
 0x475   : > { %v1703_v29 = vmul.f32 %v2979_v26, %v2971_v11  ;;  %v2952_v11 = vld [vmem:[#allocation10 + $0x98] sm:$0xff]  }
 0x476   : > { %v1706_v30 = vpack.c.bf16 %v1702_v27, %v1702_v27 }
 0x477   : > { %v1707_v32 = vpack.c.bf16 %v1703_v29, %v1703_v29 }
 0x478   : > { %2688 = vmatmul.mubr.msk.bf16.vlgmr.msra.gmra.mrb[20].mxu0 %vm1661_vm1, %v1706_v30 }
 0x479   : > { %2698 = vmatpush3.bf16.msra.mxu0 %v1495_v31  ;;  %2694 = vmatmul.mubr.msk.bf16.vlgmr.msra.gmra.mrb[20].mxu1 %vm1661_vm1, %v1707_v32 }
 0x47a   : > { %2704 = vmatpush3.bf16.msra.mxu1 %v1496_v37  ;;  %2699 = vmatprep.mubr.msk.bf16.mxu0 %vm3223_vm0, %v3222_v20  ;;  %v2934_v37 = vld [vmem:[#allocation10 + $0x10] sm:$0xff]  }
 0x47b   : > { %v2981_v33 = vpop.eup %2980  ;;  %2705 = vmatprep.mubr.msk.bf16.mxu1 %vm3223_vm0, %v3222_v20  ;;  %2709 = vmatprep.subr.bf16.mxu0 %v3222_v20 }
 0x47c   : > { %v2983_v35 = vpop.eup %2982  ;;  %v1704_v36 = vmul.f32 %v2981_v33, %v2973_v14  ;;  %2729 = vmatprep.subr.bf16.mxu1 %v3222_v20  ;;  %v2955_v14 = vld [vmem:[#allocation10 + $0xe0] sm:$0xff]  }
 0x47d   : > { %v1705_v19 = vmul.f32 %v2983_v35, %v2975_v15  ;;  %v2956_v15 = vld [vmem:[#allocation10 + $0xa8] sm:$0xff]  }
 0x47e   : > { %v1708_v31 = vpack.c.bf16 %v1704_v36, %v1704_v36 }
 0x47f   : > { %v1709_v40 = vpack.c.bf16 %v1705_v19, %v1705_v19 }
 0x480   : > { %2700 = vmatmul.mubr.msk.bf16.vlgmr.msra.gmra.mrb[24].mxu0 %vm1661_vm1, %v1708_v31 }
 0x481   : > { %2706 = vmatmul.mubr.msk.bf16.vlgmr.msra.gmra.mrb[24].mxu1 %vm1661_vm1, %v1709_v40  ;;  %2710 = vmatpush3.bf16.msra.mxu0 %v2930_v28  ;;  %v2603_v40 = vld [vmem:[%s3817_s27] ss:$0 sm:$0xff] }
 0x482   : > { %2730 = vmatpush3.bf16.msra.mxu1 %v2931_v38  ;;  %2711 = vmatprep.subr.bf16.mxu0 %v3222_v20 }
 0x483   : > { %2731 = vmatprep.subr.bf16.mxu1 %v3222_v20  ;;  %2725 = vmatprep.mubr.msk.bf16.mxu0 %vm3223_vm0, %v3222_v20 }
 0x484   : > { %2745 = vmatprep.mubr.msk.bf16.mxu1 %vm3223_vm0, %v3222_v20 }
 0x485   : > { %2712 = vmatpush3.bf16.msra.mxu0 %v2932_v23 }
 0x486   : > { %2732 = vmatpush3.bf16.msra.mxu1 %v2933_v34  ;;  %2713 = vmatprep.subr.bf16.mxu0 %v3222_v20 }
 0x487   : > { %2733 = vmatprep.subr.bf16.mxu1 %v3222_v20 }
 0x489   : > { %2714 = vmatpush3.bf16.msra.mxu0 %v2934_v37 }
 0x48a   : > { %2734 = vmatpush3.bf16.msra.mxu1 %v2935_v41  ;;  %2715 = vmatprep.subr.bf16.mxu0 %v3222_v20 }
 0x48b   : > { %2735 = vmatprep.subr.bf16.mxu1 %v3222_v20 }
 0x48d   : > { %2716 = vmatpush3.bf16.msra.mxu0 %v2936_v42 }
 0x48e   : > { %2736 = vmatpush3.bf16.msra.mxu1 %v2937_v43  ;;  %2717 = vmatprep.subr.bf16.mxu0 %v3222_v20 }
 0x48f   : > { %2737 = vmatprep.subr.bf16.mxu1 %v3222_v20 }
 0x491   : > { %2718 = vmatpush3.bf16.msra.mxu0 %v2938_v44 }
 0x492   : > { %2738 = vmatpush3.bf16.msra.mxu1 %v2939_v45  ;;  %2719 = vmatprep.subr.bf16.mxu0 %v3222_v20 }
 0x493   : > { %2739 = vmatprep.subr.bf16.mxu1 %v3222_v20 }
 0x495   : > { %2720 = vmatpush3.bf16.msra.mxu0 %v2940_v46 }
 0x496   : > { %2740 = vmatpush3.bf16.msra.mxu1 %v2941_v47  ;;  %2721 = vmatprep.subr.bf16.mxu0 %v3222_v20 }
 0x497   : > { %2741 = vmatprep.subr.bf16.mxu1 %v3222_v20 }
 0x499   : > { %2722 = vmatpush3.bf16.msra.mxu0 %v2942_v48 }
 0x49a   : > { %2742 = vmatpush3.bf16.msra.mxu1 %v2943_v49  ;;  %2723 = vmatprep.subr.bf16.mxu0 %v3222_v20 }
 0x49b   : > { %2743 = vmatprep.subr.bf16.mxu1 %v3222_v20 }
 0x49d   : > { %2724 = vmatpush3.bf16.msra.mxu0 %v2944_v50 }
 0x49e   : > { %2749 = vmatprep.subr.bf16.mxu0 %v3222_v20  ;;  %2744 = vmatpush3.bf16.msra.mxu1 %v2945_v51 }
 0x49f   : > { %2769 = vmatprep.subr.bf16.mxu1 %v3222_v20 }
 0x54b   : > { %v1747_v52 = vpop.f32.mrb[20].mxu0 }
 0x54c   : > { %v1882_v54 = vpack.c.bf16 %v1747_v52, %v1747_v52  ;;  %v2689_v55 = vpop.f32.mrb[21].mxu0  ;;  %v1790_v58 = vpop.f32.mrb[20].mxu1 }
 0x54d   : > { %v1883_v39 = vpack.c.bf16 %v1790_v58, %v1790_v58  ;;  %v1750_v60 = vpop.f32.mrb[22].mxu0  ;;  %v2695_v61 = vpop.f32.mrb[21].mxu1 }
 0x54e   : > { %v2690_v62 = vpop.f32.mrb[23].mxu0  ;;  %v1793_v63 = vpop.f32.mrb[22].mxu1  ;;  %2726 = vmatmul.mubr.bf16.vlgmr.msra.gmra.mrb[28].mxu0 %v1882_v54 }
 0x54f   : > { %2750 = vmatpush3.bf16.msra.mxu0 %v2946_v53  ;;  %v2696_v3 = vpop.f32.mrb[23].mxu1  ;;  %2746 = vmatmul.mubr.bf16.vlgmr.msra.gmra.mrb[28].mxu1 %v1883_v39 }
 0x550   : > { %2770 = vmatpush3.bf16.msra.mxu1 %v2947_v59  ;;  %2751 = vmatprep.subr.bf16.mxu0 %v3222_v20 }
 0x551   : > { %2771 = vmatprep.subr.bf16.mxu1 %v3222_v20  ;;  %2765 = vmatprep.mubr.msk.bf16.mxu0 %vm3223_vm0, %v3222_v20 }
 0x552   : > { %2785 = vmatprep.mubr.msk.bf16.mxu1 %vm3223_vm0, %v3222_v20 }
 0x553   : > { %2752 = vmatpush3.bf16.msra.mxu0 %v2948_v4  ;;  %v1833_v1 = vpop.f32.mrb[24].mxu0 }
 0x554   : > { %2772 = vmatpush3.bf16.msra.mxu1 %v2949_v5  ;;  %v2701_v6 = vpop.f32.mrb[25].mxu0  ;;  %v1876_v2 = vpop.f32.mrb[24].mxu1  ;;  %2753 = vmatprep.subr.bf16.mxu0 %v3222_v20  ;;  %v1884_v24 = vpack.c.bf16 %v1833_v1, %v1833_v1 }
 0x555   : > { %v1836_v7 = vpop.f32.mrb[26].mxu0  ;;  %v2707_v0 = vpop.f32.mrb[25].mxu1  ;;  %2773 = vmatprep.subr.bf16.mxu1 %v3222_v20  ;;  %v1885_v25 = vpack.c.bf16 %v1876_v2, %v1876_v2 }
 0x556   : > { %v2702_v8 = vpop.f32.mrb[27].mxu0  ;;  %v1879_v9 = vpop.f32.mrb[26].mxu1 }
 0x557   : > { %2754 = vmatpush3.bf16.msra.mxu0 %v2950_v57  ;;  %v2708_v10 = vpop.f32.mrb[27].mxu1 }
 0x558   : > { %2774 = vmatpush3.bf16.msra.mxu1 %v2951_v56  ;;  %2755 = vmatprep.subr.bf16.mxu0 %v3222_v20 }
 0x559   : > { %2775 = vmatprep.subr.bf16.mxu1 %v3222_v20 }
 0x55b   : > { %2756 = vmatpush3.bf16.msra.mxu0 %v2952_v11 }
 0x55c   : > { %2776 = vmatpush3.bf16.msra.mxu1 %v2953_v12  ;;  %2757 = vmatprep.subr.bf16.mxu0 %v3222_v20 }
 0x55d   : > { %2777 = vmatprep.subr.bf16.mxu1 %v3222_v20 }
 0x55f   : > { %2758 = vmatpush3.bf16.msra.mxu0 %v2954_v13 }
 0x560   : > { %2778 = vmatpush3.bf16.msra.mxu1 %v2955_v14  ;;  %2759 = vmatprep.subr.bf16.mxu0 %v3222_v20 }
 0x561   : > { %2779 = vmatprep.subr.bf16.mxu1 %v3222_v20 }
 0x563   : > { %2760 = vmatpush3.bf16.msra.mxu0 %v2956_v15 }
 0x564   : > { %2780 = vmatpush3.bf16.msra.mxu1 %v2957_v16  ;;  %2761 = vmatprep.subr.bf16.mxu0 %v3222_v20 }
 0x565   : > { %2781 = vmatprep.subr.bf16.mxu1 %v3222_v20 }
 0x567   : > { %2762 = vmatpush3.bf16.msra.mxu0 %v2958_v17 }
 0x568   : > { %2782 = vmatpush3.bf16.msra.mxu1 %v2959_v18  ;;  %2763 = vmatprep.subr.bf16.mxu0 %v3222_v20 }
 0x569   : > { %2783 = vmatprep.subr.bf16.mxu1 %v3222_v20 }
 0x56b   : > { %2764 = vmatpush3.bf16.msra.mxu0 %v2960_v21 }
 0x56c   : > { %2784 = vmatpush3.bf16.msra.mxu1 %v2961_v22 }
 0x56e   : > { %2766 = vmatmul.mubr.bf16.vlgmr.msra.gmra.mrb[32].mxu0 %v1884_v24 }
 0x56f   : > { %2786 = vmatmul.mubr.bf16.vlgmr.msra.gmra.mrb[32].mxu1 %v1885_v25 }
 0x621   : > { %v2032_v26 = vpop.f32.mrb[28].mxu0 }
 0x622   : > { %v2727_v27 = vpop.f32.mrb[29].mxu0  ;;  %v2120_v29 = vpop.f32.mrb[28].mxu1 }
 0x623   : > { %v2302_v30 = vadd.f32 %v2120_v29, %v2032_v26  ;;  %v2035_v32 = vpop.f32.mrb[30].mxu0  ;;  %v2747_v33 = vpop.f32.mrb[29].mxu1 }
 0x624   : > { %v2728_v35 = vpop.f32.mrb[31].mxu0  ;;  %v2123_v36 = vpop.f32.mrb[30].mxu1 }
 0x625   : > { %v2748_v19 = vpop.f32.mrb[31].mxu1 }
 0x641   : > { %v2208_v28 = vpop.f32.mrb[32].mxu0 }
 0x642   : > { %v2303_v31 = vadd.f32 %v2302_v30, %v2208_v28  ;;  %v2767_v20 = vpop.f32.mrb[33].mxu0  ;;  %v2296_v38 = vpop.f32.mrb[32].mxu1 }
 0x643   : > { %v2211_v23 = vpop.f32.mrb[34].mxu0  ;;  %v2787_v34 = vpop.f32.mrb[33].mxu1 }
 0x644   : > { %v2304_v37 = vadd.f32 %v2303_v31, %v2296_v38  ;;  %v2768_v41 = vpop.f32.mrb[35].mxu0  ;;  %v2299_v42 = vpop.f32.mrb[34].mxu1 }
 0x645   : > { %v2788_v43 = vpop.f32.mrb[35].mxu1 }
 0x646   : > { %v2312_v44 = vadd.f32 %v2603_v40, %v2304_v37 }
 0x648   : > { %2313 = vst [vmem:[%s511_s7] sm:$0xff] %v2312_v44 }
 0x649   : > { %3141 = shalt.err (!%p3138_p3)
}
 0x64a   : > { %s3142_s14 = scalar_lea.hbm %s3728_s8, 128  ;;  %s3146_s6 = scalar_lea.hbm %s3818_s16, 256 }
 0x64b   : > { %p3143_p9 = scmp.ne.s32.totalorder %s3728_s8, %s3142_s14  ;;  %p3147_p7 = scmp.lt.u32.totalorder %s3728_s8, %s3818_s16 }
 0x64c   : > { %p3148_p12 = scmp.lt.u32.totalorder %s3146_s6, %s3142_s14  ;;  %p3150_p1 = scmp.lt.u32.totalorder %s3142_s14, %s3728_s8 }
 0x64d   : > { %p3144_p13 = pnand %p3143_p9, %p3432_p5 }
 0x64e   : > { %p3149_p2 = por %p3148_p12, %p3147_p7 }
 0x64f   : > { %p3145_p11 = pneg %p3144_p13 }
 0x650   : > { %p3151_p4 = por %p3150_p1, %p3149_p2 }
 0x652   : > { %p3152_p0 = pnand %p3151_p4, %p3145_p11 }
 0x654   : > { %3155 = shalt.err (!%p3152_p0)
}
 0x655   : > { %2805 = dma.vmem_to_hbm [thread:$0]  (%p3432_p5), %s3730_s21, 128, %s3728_s8, %s2315_s25  }
 0x656 PF: > { %s3819_s15 = sld [smem:[#allocation17_spill]]  ;;  %s3820_s7 = sld [smem:[#allocation18_spill]] }
 0x657   : > { %p3822_p6 = scmp.ge.s32.totalorder %s3206_s24, 2 }
 0x65c   : > { %s2340_s17 = sand.u32 1, %s3819_s15   ;;  %p3821_p8 = scmp.ne.s32.totalorder %s3820_s7, 0 }
 0x65d   : > { %s2341_s18 = scalar_lea.sflag [#allocation4], %s2340_s17 }
 0x65e   : > { %p2825_p10 = pnand %p3822_p6, %p3821_p8 }
 0x660   : > { %3189 = dma.done.wait (!%p2825_p10), %s2341_s18, 128  }
 0x661   : > { %3191 = vsyncadd (!%p2825_p10), %s2341_s18, 4294967168  ;;  %p29_p3 = scmp.ge.s32.totalorder %s3418_s12, 4   ;;  %s3823_s21 = smov %s3198_s22 }
 0x662   : > { %s3824_s22 = smov %s3202_s23  ;;  %s3825_s23 = smov %s3428_s19 }
 0x663   : > { %s3826_s24 = smov %s3418_s12  ;;  %31 = sbr.rel (!%p29_p3) target bundleno = 15 (0xf), region = 138 }
 0x66a   :  { %2346 = vsyncpa [#allocation3], 1 }
 0x66b   :  { %2348 = vsyncpa [#allocation3 + $0x1], 1 }
 0x66c   :  { %2349 = vsyncpa [#allocation6], 1 }
 0x66d   :  { %2351 = vsyncpa [#allocation6 + $0x1], 1 }
 0x66e   :  { %2352 = vsyncpa [#allocation9], 1 }
 0x66f   :  { %2353 = vsyncpa [#allocation4], 1 }
 0x670   :  { %2355 = vsyncpa [#allocation4 + $0x1], 1 }

</bundles_post_ra>
